<compile_context>
chip_gen: v7x
topology: tpu7x:2x2x1
jax: 0.10.0
libtpu: 0.0.40
codegen_flags: <defaults>
</compile_context>

<pallas_src>
import functools
import math

import jax
import jax.numpy as jnp
from jax.experimental import pallas as pl
from jax.experimental.pallas import tpu as pltpu


# ---------------------------------------------------------------------------
# affine_grid + grid_sample  ->  precomputed per-channel sampling operator
# ---------------------------------------------------------------------------
def _sampling_matrix(theta, H, W):
    """S[q_out, p_in] s.t. grid_sample(img, affine_grid(theta)) == S @ img.flat.

    Matches F.affine_grid / F.grid_sample defaults: align_corners=False,
    mode='bilinear', padding_mode='zeros'.
    """
    hs = jnp.arange(H, dtype=jnp.float32)
    ws = jnp.arange(W, dtype=jnp.float32)
    yn = (2.0 * hs + 1.0) / H - 1.0          # normalized y of output rows
    xn = (2.0 * ws + 1.0) / W - 1.0          # normalized x of output cols
    xg, yg = jnp.meshgrid(xn, yn)            # (H, W), indexing='xy'

    gx = theta[0, 0] * xg + theta[0, 1] * yg + theta[0, 2]
    gy = theta[1, 0] * xg + theta[1, 1] * yg + theta[1, 2]

    ix = ((gx + 1.0) * W - 1.0) / 2.0        # unnormalize (align_corners=False)
    iy = ((gy + 1.0) * H - 1.0) / 2.0

    x0 = jnp.floor(ix); x1 = x0 + 1.0
    y0 = jnp.floor(iy); y1 = y0 + 1.0
    wx1 = ix - x0; wx0 = 1.0 - wx1
    wy1 = iy - y0; wy0 = 1.0 - wy1

    def contrib(yi, xi, w):
        inb = (yi >= 0) & (yi <= H - 1) & (xi >= 0) & (xi <= W - 1)
        w = jnp.where(inb, w, 0.0)
        yi = jnp.clip(yi, 0, H - 1).astype(jnp.int32)
        xi = jnp.clip(xi, 0, W - 1).astype(jnp.int32)
        p_in = (yi * W + xi).reshape(-1)                       # (HW,)
        oh = jax.nn.one_hot(p_in, H * W, dtype=jnp.float32)    # (HW_out, HW_in)
        return w.reshape(-1, 1) * oh

    return (contrib(y0, x0, wy0 * wx0) + contrib(y0, x1, wy0 * wx1)
            + contrib(y1, x0, wy1 * wx0) + contrib(y1, x1, wy1 * wx1))


def _layer_operator(geoParams, boxParams, H, W):
    """Per-channel warp operator (transposed) with the BoxPool mask folded in.

    out_row = mix_row @ ST_boxed[c]  ==  boxpool(grid_sample(mix))  exactly,
    since (m @ ST) * box == m @ (ST * box).
    """
    build = jax.vmap(lambda th: _sampling_matrix(th, H, W))
    S_geo = build(geoParams)                      # (C, HW_out, HW_in)
    ST = jnp.transpose(S_geo, (0, 2, 1))          # (C, HW_in, HW_out)
    S_box = build(boxParams)                      # (C, HW_out, HW_in)
    box = jnp.sum(S_box, axis=-1)                 # grid_sample of ones -> row sums
    return ST * box[:, None, :]                   # box mask folded into the operator


# ---------------------------------------------------------------------------
# Pallas kernel: one grid step == one GeomLayer (step 0 = inLay, rest = hidden)
# ---------------------------------------------------------------------------
def _gnn_layer_kernel(lin_ref, x_ref, st_ref, w_ref, b_ref,
                      feat_ref, logits_ref, h_ref, *, resCon):
    """
    lin_ref:    (L+1, C*C)   SMEM (scalar prefetch) per-layer linComb
                             (inLay row zero-padded from Cin to C columns)
    x_ref:      (C, B, HW)   VMEM  zero-padded input, resident across the grid
    st_ref:     (C, HW, HW)  VMEM  this layer's bf16 warp operator (box folded)
    w_ref:      (nbOut, C)   VMEM  dense weight (PyTorch layout)
    b_ref:      (nbOut, 1)   VMEM  dense bias
    feat_ref:   (C, B, HW)   out   featMaps, lane-dense (wrapper transposes)
    logits_ref: (nbOut, B)   out   logits^T (wrapper transposes)
    h_ref:      (C, B, HW)   VMEM scratch: activation carried across layers
    """
    l = pl.program_id(0)
    last = pl.num_programs(0) - 1
    C, B, HW = h_ref.shape

    # ---- step 0: load the (channel-padded) input into the carried state ----
    @pl.when(l == 0)
    def _():
        h_ref[...] = x_ref[...]

    h_prev = h_ref[...]                                    # (C, B, HW) f32

    # ---- channel mix on the VPU: mixed[c] = sum_d lin[l,c,d] * h_prev[d] ----
    # K = C = 8 is pure weight-load latency on the MXU, so keep it off the MXU;
    # scalars come straight from SMEM (no VMEM staging, no relayout loops).
    rows = []
    for c in range(C):
        acc = lin_ref[l, c * C] * h_prev[0]
        for d in range(1, C):
            acc = acc + lin_ref[l, c * C + d] * h_prev[d]
        rows.append(acc)
    mixed = jnp.stack(rows, axis=0)                        # (C, B, HW) f32

    # ---- per-channel warp (+ folded BoxPool): one batched bf16 MXU matmul ----
    warped = jnp.einsum('cbp,cpq->cbq',
                        mixed.astype(jnp.bfloat16), st_ref[...],
                        preferred_element_type=jnp.float32)  # (C, B, HW) f32

    # ---- residual: inLay (step 0) has no residual; hidden layers do if resCon
    if resCon:
        gate = (l > 0).astype(jnp.float32)
        h_new = warped + gate * h_prev
    else:
        h_new = warped

    h_ref[...] = h_new

    # ---- last step: featMaps + fused spatial-mean + dense head ----
    @pl.when(l == last)
    def _():
        feat_ref[...] = h_new                              # one lane-dense store
        pooled = jnp.sum(h_new, axis=-1) * (1.0 / HW)      # (C, B), XLU reduce
        logits_ref[...] = (jnp.dot(w_ref[...], pooled,
                                   preferred_element_type=jnp.float32)
                           + b_ref[...])                   # (nbOut, B)


@functools.partial(jax.jit, static_argnames=("resCon",))
def gnn_forward(x_nchw, params, *, resCon=True):
    B, Cin, H, W = x_nchw.shape
    HW = H * W
    lin_flat = params["lin"]                   # (L+1, C*C) f32   (SMEM table)
    st_all = params["st"]                      # (L+1, C, HW, HW) bf16
    w = params["dense_w"]                      # (nbOut, C)
    b = params["dense_b"]                      # (nbOut, 1)
    n_steps, C = st_all.shape[0], st_all.shape[1]
    nbOut = w.shape[0]

    # (B, Cin, H, W) -> (Cin, B, HW); zero-pad channels to C so every grid step
    # sees the same carried-activation shape (lin was zero-padded to match).
    x = jnp.transpose(x_nchw.astype(jnp.float32), (1, 0, 2, 3)).reshape(Cin, B, HW)
    if C > Cin:
        x = jnp.concatenate([x, jnp.zeros((C - Cin, B, HW), jnp.float32)], axis=0)

    kernel = functools.partial(_gnn_layer_kernel, resCon=resCon)

    grid_spec = pltpu.PrefetchScalarGridSpec(
        num_scalar_prefetch=1,                 # lin table -> SMEM
        grid=(n_steps,),                       # one GeomLayer per grid step
        in_specs=[
            # resident across the whole grid (constant block index):
            pl.BlockSpec((C, B, HW), lambda l, lin: (0, 0, 0)),
            # streamed per layer: Pallas prefetches layer l+1 while l computes
            pl.BlockSpec((None, C, HW, HW), lambda l, lin: (l, 0, 0, 0)),
            pl.BlockSpec((nbOut, C), lambda l, lin: (0, 0)),
            pl.BlockSpec((nbOut, 1), lambda l, lin: (0, 0)),
        ],
        out_specs=(
            pl.BlockSpec((C, B, HW), lambda l, lin: (0, 0, 0)),   # featMaps
            pl.BlockSpec((nbOut, B), lambda l, lin: (0, 0)),      # logits^T
        ),
        scratch_shapes=[pltpu.VMEM((C, B, HW), jnp.float32)],     # carried act.
    )

    feat_cbp, logitsT = pl.pallas_call(
        kernel,
        grid_spec=grid_spec,
        out_shape=(jax.ShapeDtypeStruct((C, B, HW), jnp.float32),
                   jax.ShapeDtypeStruct((nbOut, B), jnp.float32)),
        compiler_params=pltpu.CompilerParams(
            dimension_semantics=("arbitrary",)),   # layer chain is sequential
    )(lin_flat, x, st_all, w, b)

    logits = logitsT.T                                         # (B, nbOut)
    featMaps = jnp.transpose(feat_cbp, (1, 0, 2)).reshape(B, C, H, W)
    return logits, featMaps


# ---------------------------------------------------------------------------
# Parameter construction (deterministic)
# ---------------------------------------------------------------------------
def _init_geom_layer(key, inChan, chan, H, W):
    k1, k2, k3 = jax.random.split(key, 3)
    eye23 = jnp.eye(3, dtype=jnp.float32)[:2]                         # (2, 3)
    geoParams = eye23[None] + 0.1 * jax.random.normal(k1, (chan, 2, 3), jnp.float32)
    linComb = jax.random.uniform(k2, (chan, inChan), jnp.float32)     # torch.rand
    boxParams = eye23[None] + 0.1 * jax.random.normal(k3, (chan, 2, 3), jnp.float32)
    return linComb, _layer_operator(geoParams, boxParams, H, W)


def init_gnn_params(key, inChan, chan, nbLay, nbOut, H, W):
    assert inChan <= chan
    keys = jax.random.split(key, nbLay + 3)

    lin0, st0 = _init_geom_layer(keys[0], inChan, chan, H, W)
    lin0 = jnp.pad(lin0, ((0, 0), (0, chan - inChan)))   # zero-pad to (chan, chan)
    lins, sts = [lin0], [st0]
    for i in range(nbLay):
        li, si = _init_geom_layer(keys[1 + i], chan, chan, H, W)
        lins.append(li)
        sts.append(si)

    bound = 1.0 / math.sqrt(chan)
    return {
        # SMEM scalar table, one row per layer (inLay first)
        "lin": jnp.stack(lins).reshape(nbLay + 1, chan * chan),
        # bf16 warp operators (BoxPool folded), streamed one layer per grid step
        "st": jnp.stack(sts).astype(jnp.bfloat16),
        "dense_w": jax.random.uniform(keys[-2], (nbOut, chan), jnp.float32,
                                      minval=-bound, maxval=bound),
        "dense_b": jax.random.uniform(keys[-1], (nbOut, 1), jnp.float32,
                                      minval=-bound, maxval=bound),
    }


# ---------------------------------------------------------------------------
if __name__ == "__main__":
    inChan, chan, nbLay, nbOut = 4, 8, 2, 3
    B, H, W = 2, 16, 16

    key = jax.random.PRNGKey(0)
    k_params, k_x = jax.random.split(key)
    params = init_gnn_params(k_params, inChan, chan, nbLay, nbOut, H, W)
    x = jax.random.normal(k_x, (B, inChan, H, W), jnp.float32)

    logits, featMaps = gnn_forward(x, params)
    jax.block_until_ready((logits, featMaps))

    assert logits.shape == (B, nbOut)
    assert featMaps.shape == (B, chan, H, W)
    print("KERNEL_OK")
</pallas_src>

<mosaic_0001>
module attributes {stable_mosaic.version = 11 : i64} {
  func.func @_gnn_layer_kernel(%arg0: i32, %arg1: memref<3x64xf32, #tpu.memory_space<smem>>, %arg2: memref<8x2x256xf32, #tpu.memory_space<vmem>>, %arg3: memref<1x8x256x256xbf16, #tpu.memory_space<vmem>>, %arg4: memref<3x8xf32, #tpu.memory_space<vmem>>, %arg5: memref<3x1xf32, #tpu.memory_space<vmem>>, %arg6: memref<8x2x256xf32, #tpu.memory_space<vmem>>, %arg7: memref<3x2xf32, #tpu.memory_space<vmem>>, %arg8: memref<8x2x256xf32, #tpu.memory_space<vmem>>) attributes {dimension_semantics = [#tpu.dimension_semantics<arbitrary>], iteration_bounds = array<i64: 3>, scalar_prefetch = 1 : i64, scratch_operands = 1 : i64, tpu.core_type = #tpu.core_type<tc>, window_params = [{pipeline_mode = #tpu.pipeline_mode<synchronous>, transform_indices = @transform_0, window_bounds = array<i64: 8, 2, 256>}, {transform_indices = @transform_1, window_bounds = array<i64: 1, 8, 256, 256>}, {pipeline_mode = #tpu.pipeline_mode<synchronous>, transform_indices = @transform_2, window_bounds = array<i64: 3, 8>}, {pipeline_mode = #tpu.pipeline_mode<synchronous>, transform_indices = @transform_3, window_bounds = array<i64: 3, 1>}, {pipeline_mode = #tpu.pipeline_mode<synchronous>, transform_indices = @transform_4, window_bounds = array<i64: 8, 2, 256>}, {pipeline_mode = #tpu.pipeline_mode<synchronous>, transform_indices = @transform_5, window_bounds = array<i64: 3, 2>}]} {
    %c0_i32 = arith.constant 0 : i32
    %0 = arith.cmpi eq, %arg0, %c0_i32 : i32
    %1 = arith.extui %0 : i1 to i32
    %c0_i32_0 = arith.constant 0 : i32
    %2 = arith.cmpi ne, %1, %c0_i32_0 : i32
    scf.if %2 {
      %c0_13 = arith.constant 0 : index
      %c0_14 = arith.constant 0 : index
      %c0_15 = arith.constant 0 : index
      %467 = vector.load %arg2[%c0_13, %c0_14, %c0_15] : memref<8x2x256xf32, #tpu.memory_space<vmem>>, vector<8x2x256xf32>
      %c0_16 = arith.constant 0 : index
      %c0_17 = arith.constant 0 : index
      %c0_18 = arith.constant 0 : index
      %468 = vector.load %arg8[%c0_16, %c0_17, %c0_18] : memref<8x2x256xf32, #tpu.memory_space<vmem>>, vector<8x2x256xf32>
      tpu.vector_store %arg8[%c0_16, %c0_17, %c0_18], %467 {strides = array<i32>} : memref<8x2x256xf32, #tpu.memory_space<vmem>>, vector<8x2x256xf32>,
    } else {
    }
    %c0 = arith.constant 0 : index
    %c0_1 = arith.constant 0 : index
    %c0_2 = arith.constant 0 : index
    %3 = vector.load %arg8[%c0, %c0_1, %c0_2] : memref<8x2x256xf32, #tpu.memory_space<vmem>>, vector<8x2x256xf32>
    %4 = arith.index_cast %arg0 : i32 to index
    %c0_3 = arith.constant 0 : index
    %5 = memref.load %arg1[%4, %c0_3] : memref<3x64xf32, #tpu.memory_space<smem>>
    %6 = vector.extract_strided_slice %3 {offsets = [0, 0, 0], sizes = [1, 2, 256], strides = [1, 1, 1]} : vector<8x2x256xf32> to vector<1x2x256xf32>
    %7 = vector.shape_cast %6 : vector<1x2x256xf32> to vector<2x256xf32>
    %8 = vector.broadcast %5 : f32 to vector<2x256xf32>
    %9 = arith.mulf %8, %7 : vector<2x256xf32>
    %10 = arith.index_cast %arg0 : i32 to index
    %c1 = arith.constant 1 : index
    %11 = memref.load %arg1[%10, %c1] : memref<3x64xf32, #tpu.memory_space<smem>>
    %12 = vector.extract_strided_slice %3 {offsets = [1, 0, 0], sizes = [1, 2, 256], strides = [1, 1, 1]} : vector<8x2x256xf32> to vector<1x2x256xf32>
    %13 = vector.shape_cast %12 : vector<1x2x256xf32> to vector<2x256xf32>
    %14 = vector.broadcast %11 : f32 to vector<2x256xf32>
    %15 = arith.mulf %14, %13 : vector<2x256xf32>
    %16 = arith.addf %9, %15 : vector<2x256xf32>
    %17 = arith.index_cast %arg0 : i32 to index
    %c2 = arith.constant 2 : index
    %18 = memref.load %arg1[%17, %c2] : memref<3x64xf32, #tpu.memory_space<smem>>
    %19 = vector.extract_strided_slice %3 {offsets = [2, 0, 0], sizes = [1, 2, 256], strides = [1, 1, 1]} : vector<8x2x256xf32> to vector<1x2x256xf32>
    %20 = vector.shape_cast %19 : vector<1x2x256xf32> to vector<2x256xf32>
    %21 = vector.broadcast %18 : f32 to vector<2x256xf32>
    %22 = arith.mulf %21, %20 : vector<2x256xf32>
    %23 = arith.addf %16, %22 : vector<2x256xf32>
    %24 = arith.index_cast %arg0 : i32 to index
    %c3 = arith.constant 3 : index
    %25 = memref.load %arg1[%24, %c3] : memref<3x64xf32, #tpu.memory_space<smem>>
    %26 = vector.extract_strided_slice %3 {offsets = [3, 0, 0], sizes = [1, 2, 256], strides = [1, 1, 1]} : vector<8x2x256xf32> to vector<1x2x256xf32>
    %27 = vector.shape_cast %26 : vector<1x2x256xf32> to vector<2x256xf32>
    %28 = vector.broadcast %25 : f32 to vector<2x256xf32>
    %29 = arith.mulf %28, %27 : vector<2x256xf32>
    %30 = arith.addf %23, %29 : vector<2x256xf32>
    %31 = arith.index_cast %arg0 : i32 to index
    %c4 = arith.constant 4 : index
    %32 = memref.load %arg1[%31, %c4] : memref<3x64xf32, #tpu.memory_space<smem>>
    %33 = vector.extract_strided_slice %3 {offsets = [4, 0, 0], sizes = [1, 2, 256], strides = [1, 1, 1]} : vector<8x2x256xf32> to vector<1x2x256xf32>
    %34 = vector.shape_cast %33 : vector<1x2x256xf32> to vector<2x256xf32>
    %35 = vector.broadcast %32 : f32 to vector<2x256xf32>
    %36 = arith.mulf %35, %34 : vector<2x256xf32>
    %37 = arith.addf %30, %36 : vector<2x256xf32>
    %38 = arith.index_cast %arg0 : i32 to index
    %c5 = arith.constant 5 : index
    %39 = memref.load %arg1[%38, %c5] : memref<3x64xf32, #tpu.memory_space<smem>>
    %40 = vector.extract_strided_slice %3 {offsets = [5, 0, 0], sizes = [1, 2, 256], strides = [1, 1, 1]} : vector<8x2x256xf32> to vector<1x2x256xf32>
    %41 = vector.shape_cast %40 : vector<1x2x256xf32> to vector<2x256xf32>
    %42 = vector.broadcast %39 : f32 to vector<2x256xf32>
    %43 = arith.mulf %42, %41 : vector<2x256xf32>
    %44 = arith.addf %37, %43 : vector<2x256xf32>
    %45 = arith.index_cast %arg0 : i32 to index
    %c6 = arith.constant 6 : index
    %46 = memref.load %arg1[%45, %c6] : memref<3x64xf32, #tpu.memory_space<smem>>
    %47 = vector.extract_strided_slice %3 {offsets = [6, 0, 0], sizes = [1, 2, 256], strides = [1, 1, 1]} : vector<8x2x256xf32> to vector<1x2x256xf32>
    %48 = vector.shape_cast %47 : vector<1x2x256xf32> to vector<2x256xf32>
    %49 = vector.broadcast %46 : f32 to vector<2x256xf32>
    %50 = arith.mulf %49, %48 : vector<2x256xf32>
    %51 = arith.addf %44, %50 : vector<2x256xf32>
    %52 = arith.index_cast %arg0 : i32 to index
    %c7 = arith.constant 7 : index
    %53 = memref.load %arg1[%52, %c7] : memref<3x64xf32, #tpu.memory_space<smem>>
    %54 = vector.extract_strided_slice %3 {offsets = [7, 0, 0], sizes = [1, 2, 256], strides = [1, 1, 1]} : vector<8x2x256xf32> to vector<1x2x256xf32>
    %55 = vector.shape_cast %54 : vector<1x2x256xf32> to vector<2x256xf32>
    %56 = vector.broadcast %53 : f32 to vector<2x256xf32>
    %57 = arith.mulf %56, %55 : vector<2x256xf32>
    %58 = arith.addf %51, %57 : vector<2x256xf32>
    %59 = arith.index_cast %arg0 : i32 to index
    %c8 = arith.constant 8 : index
    %60 = memref.load %arg1[%59, %c8] : memref<3x64xf32, #tpu.memory_space<smem>>
    %61 = vector.extract_strided_slice %3 {offsets = [0, 0, 0], sizes = [1, 2, 256], strides = [1, 1, 1]} : vector<8x2x256xf32> to vector<1x2x256xf32>
    %62 = vector.shape_cast %61 : vector<1x2x256xf32> to vector<2x256xf32>
    %63 = vector.broadcast %60 : f32 to vector<2x256xf32>
    %64 = arith.mulf %63, %62 : vector<2x256xf32>
    %65 = arith.index_cast %arg0 : i32 to index
    %c9 = arith.constant 9 : index
    %66 = memref.load %arg1[%65, %c9] : memref<3x64xf32, #tpu.memory_space<smem>>
    %67 = vector.extract_strided_slice %3 {offsets = [1, 0, 0], sizes = [1, 2, 256], strides = [1, 1, 1]} : vector<8x2x256xf32> to vector<1x2x256xf32>
    %68 = vector.shape_cast %67 : vector<1x2x256xf32> to vector<2x256xf32>
    %69 = vector.broadcast %66 : f32 to vector<2x256xf32>
    %70 = arith.mulf %69, %68 : vector<2x256xf32>
    %71 = arith.addf %64, %70 : vector<2x256xf32>
    %72 = arith.index_cast %arg0 : i32 to index
    %c10 = arith.constant 10 : index
    %73 = memref.load %arg1[%72, %c10] : memref<3x64xf32, #tpu.memory_space<smem>>
    %74 = vector.extract_strided_slice %3 {offsets = [2, 0, 0], sizes = [1, 2, 256], strides = [1, 1, 1]} : vector<8x2x256xf32> to vector<1x2x256xf32>
    %75 = vector.shape_cast %74 : vector<1x2x256xf32> to vector<2x256xf32>
    %76 = vector.broadcast %73 : f32 to vector<2x256xf32>
    %77 = arith.mulf %76, %75 : vector<2x256xf32>
    %78 = arith.addf %71, %77 : vector<2x256xf32>
    %79 = arith.index_cast %arg0 : i32 to index
    %c11 = arith.constant 11 : index
    %80 = memref.load %arg1[%79, %c11] : memref<3x64xf32, #tpu.memory_space<smem>>
    %81 = vector.extract_strided_slice %3 {offsets = [3, 0, 0], sizes = [1, 2, 256], strides = [1, 1, 1]} : vector<8x2x256xf32> to vector<1x2x256xf32>
    %82 = vector.shape_cast %81 : vector<1x2x256xf32> to vector<2x256xf32>
    %83 = vector.broadcast %80 : f32 to vector<2x256xf32>
    %84 = arith.mulf %83, %82 : vector<2x256xf32>
    %85 = arith.addf %78, %84 : vector<2x256xf32>
    %86 = arith.index_cast %arg0 : i32 to index
    %c12 = arith.constant 12 : index
    %87 = memref.load %arg1[%86, %c12] : memref<3x64xf32, #tpu.memory_space<smem>>
    %88 = vector.extract_strided_slice %3 {offsets = [4, 0, 0], sizes = [1, 2, 256], strides = [1, 1, 1]} : vector<8x2x256xf32> to vector<1x2x256xf32>
    %89 = vector.shape_cast %88 : vector<1x2x256xf32> to vector<2x256xf32>
    %90 = vector.broadcast %87 : f32 to vector<2x256xf32>
    %91 = arith.mulf %90, %89 : vector<2x256xf32>
    %92 = arith.addf %85, %91 : vector<2x256xf32>
    %93 = arith.index_cast %arg0 : i32 to index
    %c13 = arith.constant 13 : index
    %94 = memref.load %arg1[%93, %c13] : memref<3x64xf32, #tpu.memory_space<smem>>
    %95 = vector.extract_strided_slice %3 {offsets = [5, 0, 0], sizes = [1, 2, 256], strides = [1, 1, 1]} : vector<8x2x256xf32> to vector<1x2x256xf32>
    %96 = vector.shape_cast %95 : vector<1x2x256xf32> to vector<2x256xf32>
    %97 = vector.broadcast %94 : f32 to vector<2x256xf32>
    %98 = arith.mulf %97, %96 : vector<2x256xf32>
    %99 = arith.addf %92, %98 : vector<2x256xf32>
    %100 = arith.index_cast %arg0 : i32 to index
    %c14 = arith.constant 14 : index
    %101 = memref.load %arg1[%100, %c14] : memref<3x64xf32, #tpu.memory_space<smem>>
    %102 = vector.extract_strided_slice %3 {offsets = [6, 0, 0], sizes = [1, 2, 256], strides = [1, 1, 1]} : vector<8x2x256xf32> to vector<1x2x256xf32>
    %103 = vector.shape_cast %102 : vector<1x2x256xf32> to vector<2x256xf32>
    %104 = vector.broadcast %101 : f32 to vector<2x256xf32>
    %105 = arith.mulf %104, %103 : vector<2x256xf32>
    %106 = arith.addf %99, %105 : vector<2x256xf32>
    %107 = arith.index_cast %arg0 : i32 to index
    %c15 = arith.constant 15 : index
    %108 = memref.load %arg1[%107, %c15] : memref<3x64xf32, #tpu.memory_space<smem>>
    %109 = vector.extract_strided_slice %3 {offsets = [7, 0, 0], sizes = [1, 2, 256], strides = [1, 1, 1]} : vector<8x2x256xf32> to vector<1x2x256xf32>
    %110 = vector.shape_cast %109 : vector<1x2x256xf32> to vector<2x256xf32>
    %111 = vector.broadcast %108 : f32 to vector<2x256xf32>
    %112 = arith.mulf %111, %110 : vector<2x256xf32>
    %113 = arith.addf %106, %112 : vector<2x256xf32>
    %114 = arith.index_cast %arg0 : i32 to index
    %c16 = arith.constant 16 : index
    %115 = memref.load %arg1[%114, %c16] : memref<3x64xf32, #tpu.memory_space<smem>>
    %116 = vector.extract_strided_slice %3 {offsets = [0, 0, 0], sizes = [1, 2, 256], strides = [1, 1, 1]} : vector<8x2x256xf32> to vector<1x2x256xf32>
    %117 = vector.shape_cast %116 : vector<1x2x256xf32> to vector<2x256xf32>
    %118 = vector.broadcast %115 : f32 to vector<2x256xf32>
    %119 = arith.mulf %118, %117 : vector<2x256xf32>
    %120 = arith.index_cast %arg0 : i32 to index
    %c17 = arith.constant 17 : index
    %121 = memref.load %arg1[%120, %c17] : memref<3x64xf32, #tpu.memory_space<smem>>
    %122 = vector.extract_strided_slice %3 {offsets = [1, 0, 0], sizes = [1, 2, 256], strides = [1, 1, 1]} : vector<8x2x256xf32> to vector<1x2x256xf32>
    %123 = vector.shape_cast %122 : vector<1x2x256xf32> to vector<2x256xf32>
    %124 = vector.broadcast %121 : f32 to vector<2x256xf32>
    %125 = arith.mulf %124, %123 : vector<2x256xf32>
    %126 = arith.addf %119, %125 : vector<2x256xf32>
    %127 = arith.index_cast %arg0 : i32 to index
    %c18 = arith.constant 18 : index
    %128 = memref.load %arg1[%127, %c18] : memref<3x64xf32, #tpu.memory_space<smem>>
    %129 = vector.extract_strided_slice %3 {offsets = [2, 0, 0], sizes = [1, 2, 256], strides = [1, 1, 1]} : vector<8x2x256xf32> to vector<1x2x256xf32>
    %130 = vector.shape_cast %129 : vector<1x2x256xf32> to vector<2x256xf32>
    %131 = vector.broadcast %128 : f32 to vector<2x256xf32>
    %132 = arith.mulf %131, %130 : vector<2x256xf32>
    %133 = arith.addf %126, %132 : vector<2x256xf32>
    %134 = arith.index_cast %arg0 : i32 to index
    %c19 = arith.constant 19 : index
    %135 = memref.load %arg1[%134, %c19] : memref<3x64xf32, #tpu.memory_space<smem>>
    %136 = vector.extract_strided_slice %3 {offsets = [3, 0, 0], sizes = [1, 2, 256], strides = [1, 1, 1]} : vector<8x2x256xf32> to vector<1x2x256xf32>
    %137 = vector.shape_cast %136 : vector<1x2x256xf32> to vector<2x256xf32>
    %138 = vector.broadcast %135 : f32 to vector<2x256xf32>
    %139 = arith.mulf %138, %137 : vector<2x256xf32>
    %140 = arith.addf %133, %139 : vector<2x256xf32>
    %141 = arith.index_cast %arg0 : i32 to index
    %c20 = arith.constant 20 : index
    %142 = memref.load %arg1[%141, %c20] : memref<3x64xf32, #tpu.memory_space<smem>>
    %143 = vector.extract_strided_slice %3 {offsets = [4, 0, 0], sizes = [1, 2, 256], strides = [1, 1, 1]} : vector<8x2x256xf32> to vector<1x2x256xf32>
    %144 = vector.shape_cast %143 : vector<1x2x256xf32> to vector<2x256xf32>
    %145 = vector.broadcast %142 : f32 to vector<2x256xf32>
    %146 = arith.mulf %145, %144 : vector<2x256xf32>
    %147 = arith.addf %140, %146 : vector<2x256xf32>
    %148 = arith.index_cast %arg0 : i32 to index
    %c21 = arith.constant 21 : index
    %149 = memref.load %arg1[%148, %c21] : memref<3x64xf32, #tpu.memory_space<smem>>
    %150 = vector.extract_strided_slice %3 {offsets = [5, 0, 0], sizes = [1, 2, 256], strides = [1, 1, 1]} : vector<8x2x256xf32> to vector<1x2x256xf32>
    %151 = vector.shape_cast %150 : vector<1x2x256xf32> to vector<2x256xf32>
    %152 = vector.broadcast %149 : f32 to vector<2x256xf32>
    %153 = arith.mulf %152, %151 : vector<2x256xf32>
    %154 = arith.addf %147, %153 : vector<2x256xf32>
    %155 = arith.index_cast %arg0 : i32 to index
    %c22 = arith.constant 22 : index
    %156 = memref.load %arg1[%155, %c22] : memref<3x64xf32, #tpu.memory_space<smem>>
    %157 = vector.extract_strided_slice %3 {offsets = [6, 0, 0], sizes = [1, 2, 256], strides = [1, 1, 1]} : vector<8x2x256xf32> to vector<1x2x256xf32>
    %158 = vector.shape_cast %157 : vector<1x2x256xf32> to vector<2x256xf32>
    %159 = vector.broadcast %156 : f32 to vector<2x256xf32>
    %160 = arith.mulf %159, %158 : vector<2x256xf32>
    %161 = arith.addf %154, %160 : vector<2x256xf32>
    %162 = arith.index_cast %arg0 : i32 to index
    %c23 = arith.constant 23 : index
    %163 = memref.load %arg1[%162, %c23] : memref<3x64xf32, #tpu.memory_space<smem>>
    %164 = vector.extract_strided_slice %3 {offsets = [7, 0, 0], sizes = [1, 2, 256], strides = [1, 1, 1]} : vector<8x2x256xf32> to vector<1x2x256xf32>
    %165 = vector.shape_cast %164 : vector<1x2x256xf32> to vector<2x256xf32>
    %166 = vector.broadcast %163 : f32 to vector<2x256xf32>
    %167 = arith.mulf %166, %165 : vector<2x256xf32>
    %168 = arith.addf %161, %167 : vector<2x256xf32>
    %169 = arith.index_cast %arg0 : i32 to index
    %c24 = arith.constant 24 : index
    %170 = memref.load %arg1[%169, %c24] : memref<3x64xf32, #tpu.memory_space<smem>>
    %171 = vector.extract_strided_slice %3 {offsets = [0, 0, 0], sizes = [1, 2, 256], strides = [1, 1, 1]} : vector<8x2x256xf32> to vector<1x2x256xf32>
    %172 = vector.shape_cast %171 : vector<1x2x256xf32> to vector<2x256xf32>
    %173 = vector.broadcast %170 : f32 to vector<2x256xf32>
    %174 = arith.mulf %173, %172 : vector<2x256xf32>
    %175 = arith.index_cast %arg0 : i32 to index
    %c25 = arith.constant 25 : index
    %176 = memref.load %arg1[%175, %c25] : memref<3x64xf32, #tpu.memory_space<smem>>
    %177 = vector.extract_strided_slice %3 {offsets = [1, 0, 0], sizes = [1, 2, 256], strides = [1, 1, 1]} : vector<8x2x256xf32> to vector<1x2x256xf32>
    %178 = vector.shape_cast %177 : vector<1x2x256xf32> to vector<2x256xf32>
    %179 = vector.broadcast %176 : f32 to vector<2x256xf32>
    %180 = arith.mulf %179, %178 : vector<2x256xf32>
    %181 = arith.addf %174, %180 : vector<2x256xf32>
    %182 = arith.index_cast %arg0 : i32 to index
    %c26 = arith.constant 26 : index
    %183 = memref.load %arg1[%182, %c26] : memref<3x64xf32, #tpu.memory_space<smem>>
    %184 = vector.extract_strided_slice %3 {offsets = [2, 0, 0], sizes = [1, 2, 256], strides = [1, 1, 1]} : vector<8x2x256xf32> to vector<1x2x256xf32>
    %185 = vector.shape_cast %184 : vector<1x2x256xf32> to vector<2x256xf32>
    %186 = vector.broadcast %183 : f32 to vector<2x256xf32>
    %187 = arith.mulf %186, %185 : vector<2x256xf32>
    %188 = arith.addf %181, %187 : vector<2x256xf32>
    %189 = arith.index_cast %arg0 : i32 to index
    %c27 = arith.constant 27 : index
    %190 = memref.load %arg1[%189, %c27] : memref<3x64xf32, #tpu.memory_space<smem>>
    %191 = vector.extract_strided_slice %3 {offsets = [3, 0, 0], sizes = [1, 2, 256], strides = [1, 1, 1]} : vector<8x2x256xf32> to vector<1x2x256xf32>
    %192 = vector.shape_cast %191 : vector<1x2x256xf32> to vector<2x256xf32>
    %193 = vector.broadcast %190 : f32 to vector<2x256xf32>
    %194 = arith.mulf %193, %192 : vector<2x256xf32>
    %195 = arith.addf %188, %194 : vector<2x256xf32>
    %196 = arith.index_cast %arg0 : i32 to index
    %c28 = arith.constant 28 : index
    %197 = memref.load %arg1[%196, %c28] : memref<3x64xf32, #tpu.memory_space<smem>>
    %198 = vector.extract_strided_slice %3 {offsets = [4, 0, 0], sizes = [1, 2, 256], strides = [1, 1, 1]} : vector<8x2x256xf32> to vector<1x2x256xf32>
    %199 = vector.shape_cast %198 : vector<1x2x256xf32> to vector<2x256xf32>
    %200 = vector.broadcast %197 : f32 to vector<2x256xf32>
    %201 = arith.mulf %200, %199 : vector<2x256xf32>
    %202 = arith.addf %195, %201 : vector<2x256xf32>
    %203 = arith.index_cast %arg0 : i32 to index
    %c29 = arith.constant 29 : index
    %204 = memref.load %arg1[%203, %c29] : memref<3x64xf32, #tpu.memory_space<smem>>
    %205 = vector.extract_strided_slice %3 {offsets = [5, 0, 0], sizes = [1, 2, 256], strides = [1, 1, 1]} : vector<8x2x256xf32> to vector<1x2x256xf32>
    %206 = vector.shape_cast %205 : vector<1x2x256xf32> to vector<2x256xf32>
    %207 = vector.broadcast %204 : f32 to vector<2x256xf32>
    %208 = arith.mulf %207, %206 : vector<2x256xf32>
    %209 = arith.addf %202, %208 : vector<2x256xf32>
    %210 = arith.index_cast %arg0 : i32 to index
    %c30 = arith.constant 30 : index
    %211 = memref.load %arg1[%210, %c30] : memref<3x64xf32, #tpu.memory_space<smem>>
    %212 = vector.extract_strided_slice %3 {offsets = [6, 0, 0], sizes = [1, 2, 256], strides = [1, 1, 1]} : vector<8x2x256xf32> to vector<1x2x256xf32>
    %213 = vector.shape_cast %212 : vector<1x2x256xf32> to vector<2x256xf32>
    %214 = vector.broadcast %211 : f32 to vector<2x256xf32>
    %215 = arith.mulf %214, %213 : vector<2x256xf32>
    %216 = arith.addf %209, %215 : vector<2x256xf32>
    %217 = arith.index_cast %arg0 : i32 to index
    %c31 = arith.constant 31 : index
    %218 = memref.load %arg1[%217, %c31] : memref<3x64xf32, #tpu.memory_space<smem>>
    %219 = vector.extract_strided_slice %3 {offsets = [7, 0, 0], sizes = [1, 2, 256], strides = [1, 1, 1]} : vector<8x2x256xf32> to vector<1x2x256xf32>
    %220 = vector.shape_cast %219 : vector<1x2x256xf32> to vector<2x256xf32>
    %221 = vector.broadcast %218 : f32 to vector<2x256xf32>
    %222 = arith.mulf %221, %220 : vector<2x256xf32>
    %223 = arith.addf %216, %222 : vector<2x256xf32>
    %224 = arith.index_cast %arg0 : i32 to index
    %c32 = arith.constant 32 : index
    %225 = memref.load %arg1[%224, %c32] : memref<3x64xf32, #tpu.memory_space<smem>>
    %226 = vector.extract_strided_slice %3 {offsets = [0, 0, 0], sizes = [1, 2, 256], strides = [1, 1, 1]} : vector<8x2x256xf32> to vector<1x2x256xf32>
    %227 = vector.shape_cast %226 : vector<1x2x256xf32> to vector<2x256xf32>
    %228 = vector.broadcast %225 : f32 to vector<2x256xf32>
    %229 = arith.mulf %228, %227 : vector<2x256xf32>
    %230 = arith.index_cast %arg0 : i32 to index
    %c33 = arith.constant 33 : index
    %231 = memref.load %arg1[%230, %c33] : memref<3x64xf32, #tpu.memory_space<smem>>
    %232 = vector.extract_strided_slice %3 {offsets = [1, 0, 0], sizes = [1, 2, 256], strides = [1, 1, 1]} : vector<8x2x256xf32> to vector<1x2x256xf32>
    %233 = vector.shape_cast %232 : vector<1x2x256xf32> to vector<2x256xf32>
    %234 = vector.broadcast %231 : f32 to vector<2x256xf32>
    %235 = arith.mulf %234, %233 : vector<2x256xf32>
    %236 = arith.addf %229, %235 : vector<2x256xf32>
    %237 = arith.index_cast %arg0 : i32 to index
    %c34 = arith.constant 34 : index
    %238 = memref.load %arg1[%237, %c34] : memref<3x64xf32, #tpu.memory_space<smem>>
    %239 = vector.extract_strided_slice %3 {offsets = [2, 0, 0], sizes = [1, 2, 256], strides = [1, 1, 1]} : vector<8x2x256xf32> to vector<1x2x256xf32>
    %240 = vector.shape_cast %239 : vector<1x2x256xf32> to vector<2x256xf32>
    %241 = vector.broadcast %238 : f32 to vector<2x256xf32>
    %242 = arith.mulf %241, %240 : vector<2x256xf32>
    %243 = arith.addf %236, %242 : vector<2x256xf32>
    %244 = arith.index_cast %arg0 : i32 to index
    %c35 = arith.constant 35 : index
    %245 = memref.load %arg1[%244, %c35] : memref<3x64xf32, #tpu.memory_space<smem>>
    %246 = vector.extract_strided_slice %3 {offsets = [3, 0, 0], sizes = [1, 2, 256], strides = [1, 1, 1]} : vector<8x2x256xf32> to vector<1x2x256xf32>
    %247 = vector.shape_cast %246 : vector<1x2x256xf32> to vector<2x256xf32>
    %248 = vector.broadcast %245 : f32 to vector<2x256xf32>
    %249 = arith.mulf %248, %247 : vector<2x256xf32>
    %250 = arith.addf %243, %249 : vector<2x256xf32>
    %251 = arith.index_cast %arg0 : i32 to index
    %c36 = arith.constant 36 : index
    %252 = memref.load %arg1[%251, %c36] : memref<3x64xf32, #tpu.memory_space<smem>>
    %253 = vector.extract_strided_slice %3 {offsets = [4, 0, 0], sizes = [1, 2, 256], strides = [1, 1, 1]} : vector<8x2x256xf32> to vector<1x2x256xf32>
    %254 = vector.shape_cast %253 : vector<1x2x256xf32> to vector<2x256xf32>
    %255 = vector.broadcast %252 : f32 to vector<2x256xf32>
    %256 = arith.mulf %255, %254 : vector<2x256xf32>
    %257 = arith.addf %250, %256 : vector<2x256xf32>
    %258 = arith.index_cast %arg0 : i32 to index
    %c37 = arith.constant 37 : index
    %259 = memref.load %arg1[%258, %c37] : memref<3x64xf32, #tpu.memory_space<smem>>
    %260 = vector.extract_strided_slice %3 {offsets = [5, 0, 0], sizes = [1, 2, 256], strides = [1, 1, 1]} : vector<8x2x256xf32> to vector<1x2x256xf32>
    %261 = vector.shape_cast %260 : vector<1x2x256xf32> to vector<2x256xf32>
    %262 = vector.broadcast %259 : f32 to vector<2x256xf32>
    %263 = arith.mulf %262, %261 : vector<2x256xf32>
    %264 = arith.addf %257, %263 : vector<2x256xf32>
    %265 = arith.index_cast %arg0 : i32 to index
    %c38 = arith.constant 38 : index
    %266 = memref.load %arg1[%265, %c38] : memref<3x64xf32, #tpu.memory_space<smem>>
    %267 = vector.extract_strided_slice %3 {offsets = [6, 0, 0], sizes = [1, 2, 256], strides = [1, 1, 1]} : vector<8x2x256xf32> to vector<1x2x256xf32>
    %268 = vector.shape_cast %267 : vector<1x2x256xf32> to vector<2x256xf32>
    %269 = vector.broadcast %266 : f32 to vector<2x256xf32>
    %270 = arith.mulf %269, %268 : vector<2x256xf32>
    %271 = arith.addf %264, %270 : vector<2x256xf32>
    %272 = arith.index_cast %arg0 : i32 to index
    %c39 = arith.constant 39 : index
    %273 = memref.load %arg1[%272, %c39] : memref<3x64xf32, #tpu.memory_space<smem>>
    %274 = vector.extract_strided_slice %3 {offsets = [7, 0, 0], sizes = [1, 2, 256], strides = [1, 1, 1]} : vector<8x2x256xf32> to vector<1x2x256xf32>
    %275 = vector.shape_cast %274 : vector<1x2x256xf32> to vector<2x256xf32>
    %276 = vector.broadcast %273 : f32 to vector<2x256xf32>
    %277 = arith.mulf %276, %275 : vector<2x256xf32>
    %278 = arith.addf %271, %277 : vector<2x256xf32>
    %279 = arith.index_cast %arg0 : i32 to index
    %c40 = arith.constant 40 : index
    %280 = memref.load %arg1[%279, %c40] : memref<3x64xf32, #tpu.memory_space<smem>>
    %281 = vector.extract_strided_slice %3 {offsets = [0, 0, 0], sizes = [1, 2, 256], strides = [1, 1, 1]} : vector<8x2x256xf32> to vector<1x2x256xf32>
    %282 = vector.shape_cast %281 : vector<1x2x256xf32> to vector<2x256xf32>
    %283 = vector.broadcast %280 : f32 to vector<2x256xf32>
    %284 = arith.mulf %283, %282 : vector<2x256xf32>
    %285 = arith.index_cast %arg0 : i32 to index
    %c41 = arith.constant 41 : index
    %286 = memref.load %arg1[%285, %c41] : memref<3x64xf32, #tpu.memory_space<smem>>
    %287 = vector.extract_strided_slice %3 {offsets = [1, 0, 0], sizes = [1, 2, 256], strides = [1, 1, 1]} : vector<8x2x256xf32> to vector<1x2x256xf32>
    %288 = vector.shape_cast %287 : vector<1x2x256xf32> to vector<2x256xf32>
    %289 = vector.broadcast %286 : f32 to vector<2x256xf32>
    %290 = arith.mulf %289, %288 : vector<2x256xf32>
    %291 = arith.addf %284, %290 : vector<2x256xf32>
    %292 = arith.index_cast %arg0 : i32 to index
    %c42 = arith.constant 42 : index
    %293 = memref.load %arg1[%292, %c42] : memref<3x64xf32, #tpu.memory_space<smem>>
    %294 = vector.extract_strided_slice %3 {offsets = [2, 0, 0], sizes = [1, 2, 256], strides = [1, 1, 1]} : vector<8x2x256xf32> to vector<1x2x256xf32>
    %295 = vector.shape_cast %294 : vector<1x2x256xf32> to vector<2x256xf32>
    %296 = vector.broadcast %293 : f32 to vector<2x256xf32>
    %297 = arith.mulf %296, %295 : vector<2x256xf32>
    %298 = arith.addf %291, %297 : vector<2x256xf32>
    %299 = arith.index_cast %arg0 : i32 to index
    %c43 = arith.constant 43 : index
    %300 = memref.load %arg1[%299, %c43] : memref<3x64xf32, #tpu.memory_space<smem>>
    %301 = vector.extract_strided_slice %3 {offsets = [3, 0, 0], sizes = [1, 2, 256], strides = [1, 1, 1]} : vector<8x2x256xf32> to vector<1x2x256xf32>
    %302 = vector.shape_cast %301 : vector<1x2x256xf32> to vector<2x256xf32>
    %303 = vector.broadcast %300 : f32 to vector<2x256xf32>
    %304 = arith.mulf %303, %302 : vector<2x256xf32>
    %305 = arith.addf %298, %304 : vector<2x256xf32>
    %306 = arith.index_cast %arg0 : i32 to index
    %c44 = arith.constant 44 : index
    %307 = memref.load %arg1[%306, %c44] : memref<3x64xf32, #tpu.memory_space<smem>>
    %308 = vector.extract_strided_slice %3 {offsets = [4, 0, 0], sizes = [1, 2, 256], strides = [1, 1, 1]} : vector<8x2x256xf32> to vector<1x2x256xf32>
    %309 = vector.shape_cast %308 : vector<1x2x256xf32> to vector<2x256xf32>
    %310 = vector.broadcast %307 : f32 to vector<2x256xf32>
    %311 = arith.mulf %310, %309 : vector<2x256xf32>
    %312 = arith.addf %305, %311 : vector<2x256xf32>
    %313 = arith.index_cast %arg0 : i32 to index
    %c45 = arith.constant 45 : index
    %314 = memref.load %arg1[%313, %c45] : memref<3x64xf32, #tpu.memory_space<smem>>
    %315 = vector.extract_strided_slice %3 {offsets = [5, 0, 0], sizes = [1, 2, 256], strides = [1, 1, 1]} : vector<8x2x256xf32> to vector<1x2x256xf32>
    %316 = vector.shape_cast %315 : vector<1x2x256xf32> to vector<2x256xf32>
    %317 = vector.broadcast %314 : f32 to vector<2x256xf32>
    %318 = arith.mulf %317, %316 : vector<2x256xf32>
    %319 = arith.addf %312, %318 : vector<2x256xf32>
    %320 = arith.index_cast %arg0 : i32 to index
    %c46 = arith.constant 46 : index
    %321 = memref.load %arg1[%320, %c46] : memref<3x64xf32, #tpu.memory_space<smem>>
    %322 = vector.extract_strided_slice %3 {offsets = [6, 0, 0], sizes = [1, 2, 256], strides = [1, 1, 1]} : vector<8x2x256xf32> to vector<1x2x256xf32>
    %323 = vector.shape_cast %322 : vector<1x2x256xf32> to vector<2x256xf32>
    %324 = vector.broadcast %321 : f32 to vector<2x256xf32>
    %325 = arith.mulf %324, %323 : vector<2x256xf32>
    %326 = arith.addf %319, %325 : vector<2x256xf32>
    %327 = arith.index_cast %arg0 : i32 to index
    %c47 = arith.constant 47 : index
    %328 = memref.load %arg1[%327, %c47] : memref<3x64xf32, #tpu.memory_space<smem>>
    %329 = vector.extract_strided_slice %3 {offsets = [7, 0, 0], sizes = [1, 2, 256], strides = [1, 1, 1]} : vector<8x2x256xf32> to vector<1x2x256xf32>
    %330 = vector.shape_cast %329 : vector<1x2x256xf32> to vector<2x256xf32>
    %331 = vector.broadcast %328 : f32 to vector<2x256xf32>
    %332 = arith.mulf %331, %330 : vector<2x256xf32>
    %333 = arith.addf %326, %332 : vector<2x256xf32>
    %334 = arith.index_cast %arg0 : i32 to index
    %c48 = arith.constant 48 : index
    %335 = memref.load %arg1[%334, %c48] : memref<3x64xf32, #tpu.memory_space<smem>>
    %336 = vector.extract_strided_slice %3 {offsets = [0, 0, 0], sizes = [1, 2, 256], strides = [1, 1, 1]} : vector<8x2x256xf32> to vector<1x2x256xf32>
    %337 = vector.shape_cast %336 : vector<1x2x256xf32> to vector<2x256xf32>
    %338 = vector.broadcast %335 : f32 to vector<2x256xf32>
    %339 = arith.mulf %338, %337 : vector<2x256xf32>
    %340 = arith.index_cast %arg0 : i32 to index
    %c49 = arith.constant 49 : index
    %341 = memref.load %arg1[%340, %c49] : memref<3x64xf32, #tpu.memory_space<smem>>
    %342 = vector.extract_strided_slice %3 {offsets = [1, 0, 0], sizes = [1, 2, 256], strides = [1, 1, 1]} : vector<8x2x256xf32> to vector<1x2x256xf32>
    %343 = vector.shape_cast %342 : vector<1x2x256xf32> to vector<2x256xf32>
    %344 = vector.broadcast %341 : f32 to vector<2x256xf32>
    %345 = arith.mulf %344, %343 : vector<2x256xf32>
    %346 = arith.addf %339, %345 : vector<2x256xf32>
    %347 = arith.index_cast %arg0 : i32 to index
    %c50 = arith.constant 50 : index
    %348 = memref.load %arg1[%347, %c50] : memref<3x64xf32, #tpu.memory_space<smem>>
    %349 = vector.extract_strided_slice %3 {offsets = [2, 0, 0], sizes = [1, 2, 256], strides = [1, 1, 1]} : vector<8x2x256xf32> to vector<1x2x256xf32>
    %350 = vector.shape_cast %349 : vector<1x2x256xf32> to vector<2x256xf32>
    %351 = vector.broadcast %348 : f32 to vector<2x256xf32>
    %352 = arith.mulf %351, %350 : vector<2x256xf32>
    %353 = arith.addf %346, %352 : vector<2x256xf32>
    %354 = arith.index_cast %arg0 : i32 to index
    %c51 = arith.constant 51 : index
    %355 = memref.load %arg1[%354, %c51] : memref<3x64xf32, #tpu.memory_space<smem>>
    %356 = vector.extract_strided_slice %3 {offsets = [3, 0, 0], sizes = [1, 2, 256], strides = [1, 1, 1]} : vector<8x2x256xf32> to vector<1x2x256xf32>
    %357 = vector.shape_cast %356 : vector<1x2x256xf32> to vector<2x256xf32>
    %358 = vector.broadcast %355 : f32 to vector<2x256xf32>
    %359 = arith.mulf %358, %357 : vector<2x256xf32>
    %360 = arith.addf %353, %359 : vector<2x256xf32>
    %361 = arith.index_cast %arg0 : i32 to index
    %c52 = arith.constant 52 : index
    %362 = memref.load %arg1[%361, %c52] : memref<3x64xf32, #tpu.memory_space<smem>>
    %363 = vector.extract_strided_slice %3 {offsets = [4, 0, 0], sizes = [1, 2, 256], strides = [1, 1, 1]} : vector<8x2x256xf32> to vector<1x2x256xf32>
    %364 = vector.shape_cast %363 : vector<1x2x256xf32> to vector<2x256xf32>
    %365 = vector.broadcast %362 : f32 to vector<2x256xf32>
    %366 = arith.mulf %365, %364 : vector<2x256xf32>
    %367 = arith.addf %360, %366 : vector<2x256xf32>
    %368 = arith.index_cast %arg0 : i32 to index
    %c53 = arith.constant 53 : index
    %369 = memref.load %arg1[%368, %c53] : memref<3x64xf32, #tpu.memory_space<smem>>
    %370 = vector.extract_strided_slice %3 {offsets = [5, 0, 0], sizes = [1, 2, 256], strides = [1, 1, 1]} : vector<8x2x256xf32> to vector<1x2x256xf32>
    %371 = vector.shape_cast %370 : vector<1x2x256xf32> to vector<2x256xf32>
    %372 = vector.broadcast %369 : f32 to vector<2x256xf32>
    %373 = arith.mulf %372, %371 : vector<2x256xf32>
    %374 = arith.addf %367, %373 : vector<2x256xf32>
    %375 = arith.index_cast %arg0 : i32 to index
    %c54 = arith.constant 54 : index
    %376 = memref.load %arg1[%375, %c54] : memref<3x64xf32, #tpu.memory_space<smem>>
    %377 = vector.extract_strided_slice %3 {offsets = [6, 0, 0], sizes = [1, 2, 256], strides = [1, 1, 1]} : vector<8x2x256xf32> to vector<1x2x256xf32>
    %378 = vector.shape_cast %377 : vector<1x2x256xf32> to vector<2x256xf32>
    %379 = vector.broadcast %376 : f32 to vector<2x256xf32>
    %380 = arith.mulf %379, %378 : vector<2x256xf32>
    %381 = arith.addf %374, %380 : vector<2x256xf32>
    %382 = arith.index_cast %arg0 : i32 to index
    %c55 = arith.constant 55 : index
    %383 = memref.load %arg1[%382, %c55] : memref<3x64xf32, #tpu.memory_space<smem>>
    %384 = vector.extract_strided_slice %3 {offsets = [7, 0, 0], sizes = [1, 2, 256], strides = [1, 1, 1]} : vector<8x2x256xf32> to vector<1x2x256xf32>
    %385 = vector.shape_cast %384 : vector<1x2x256xf32> to vector<2x256xf32>
    %386 = vector.broadcast %383 : f32 to vector<2x256xf32>
    %387 = arith.mulf %386, %385 : vector<2x256xf32>
    %388 = arith.addf %381, %387 : vector<2x256xf32>
    %389 = arith.index_cast %arg0 : i32 to index
    %c56 = arith.constant 56 : index
    %390 = memref.load %arg1[%389, %c56] : memref<3x64xf32, #tpu.memory_space<smem>>
    %391 = vector.extract_strided_slice %3 {offsets = [0, 0, 0], sizes = [1, 2, 256], strides = [1, 1, 1]} : vector<8x2x256xf32> to vector<1x2x256xf32>
    %392 = vector.shape_cast %391 : vector<1x2x256xf32> to vector<2x256xf32>
    %393 = vector.broadcast %390 : f32 to vector<2x256xf32>
    %394 = arith.mulf %393, %392 : vector<2x256xf32>
    %395 = arith.index_cast %arg0 : i32 to index
    %c57 = arith.constant 57 : index
    %396 = memref.load %arg1[%395, %c57] : memref<3x64xf32, #tpu.memory_space<smem>>
    %397 = vector.extract_strided_slice %3 {offsets = [1, 0, 0], sizes = [1, 2, 256], strides = [1, 1, 1]} : vector<8x2x256xf32> to vector<1x2x256xf32>
    %398 = vector.shape_cast %397 : vector<1x2x256xf32> to vector<2x256xf32>
    %399 = vector.broadcast %396 : f32 to vector<2x256xf32>
    %400 = arith.mulf %399, %398 : vector<2x256xf32>
    %401 = arith.addf %394, %400 : vector<2x256xf32>
    %402 = arith.index_cast %arg0 : i32 to index
    %c58 = arith.constant 58 : index
    %403 = memref.load %arg1[%402, %c58] : memref<3x64xf32, #tpu.memory_space<smem>>
    %404 = vector.extract_strided_slice %3 {offsets = [2, 0, 0], sizes = [1, 2, 256], strides = [1, 1, 1]} : vector<8x2x256xf32> to vector<1x2x256xf32>
    %405 = vector.shape_cast %404 : vector<1x2x256xf32> to vector<2x256xf32>
    %406 = vector.broadcast %403 : f32 to vector<2x256xf32>
    %407 = arith.mulf %406, %405 : vector<2x256xf32>
    %408 = arith.addf %401, %407 : vector<2x256xf32>
    %409 = arith.index_cast %arg0 : i32 to index
    %c59 = arith.constant 59 : index
    %410 = memref.load %arg1[%409, %c59] : memref<3x64xf32, #tpu.memory_space<smem>>
    %411 = vector.extract_strided_slice %3 {offsets = [3, 0, 0], sizes = [1, 2, 256], strides = [1, 1, 1]} : vector<8x2x256xf32> to vector<1x2x256xf32>
    %412 = vector.shape_cast %411 : vector<1x2x256xf32> to vector<2x256xf32>
    %413 = vector.broadcast %410 : f32 to vector<2x256xf32>
    %414 = arith.mulf %413, %412 : vector<2x256xf32>
    %415 = arith.addf %408, %414 : vector<2x256xf32>
    %416 = arith.index_cast %arg0 : i32 to index
    %c60 = arith.constant 60 : index
    %417 = memref.load %arg1[%416, %c60] : memref<3x64xf32, #tpu.memory_space<smem>>
    %418 = vector.extract_strided_slice %3 {offsets = [4, 0, 0], sizes = [1, 2, 256], strides = [1, 1, 1]} : vector<8x2x256xf32> to vector<1x2x256xf32>
    %419 = vector.shape_cast %418 : vector<1x2x256xf32> to vector<2x256xf32>
    %420 = vector.broadcast %417 : f32 to vector<2x256xf32>
    %421 = arith.mulf %420, %419 : vector<2x256xf32>
    %422 = arith.addf %415, %421 : vector<2x256xf32>
    %423 = arith.index_cast %arg0 : i32 to index
    %c61 = arith.constant 61 : index
    %424 = memref.load %arg1[%423, %c61] : memref<3x64xf32, #tpu.memory_space<smem>>
    %425 = vector.extract_strided_slice %3 {offsets = [5, 0, 0], sizes = [1, 2, 256], strides = [1, 1, 1]} : vector<8x2x256xf32> to vector<1x2x256xf32>
    %426 = vector.shape_cast %425 : vector<1x2x256xf32> to vector<2x256xf32>
    %427 = vector.broadcast %424 : f32 to vector<2x256xf32>
    %428 = arith.mulf %427, %426 : vector<2x256xf32>
    %429 = arith.addf %422, %428 : vector<2x256xf32>
    %430 = arith.index_cast %arg0 : i32 to index
    %c62 = arith.constant 62 : index
    %431 = memref.load %arg1[%430, %c62] : memref<3x64xf32, #tpu.memory_space<smem>>
    %432 = vector.extract_strided_slice %3 {offsets = [6, 0, 0], sizes = [1, 2, 256], strides = [1, 1, 1]} : vector<8x2x256xf32> to vector<1x2x256xf32>
    %433 = vector.shape_cast %432 : vector<1x2x256xf32> to vector<2x256xf32>
    %434 = vector.broadcast %431 : f32 to vector<2x256xf32>
    %435 = arith.mulf %434, %433 : vector<2x256xf32>
    %436 = arith.addf %429, %435 : vector<2x256xf32>
    %437 = arith.index_cast %arg0 : i32 to index
    %c63 = arith.constant 63 : index
    %438 = memref.load %arg1[%437, %c63] : memref<3x64xf32, #tpu.memory_space<smem>>
    %439 = vector.extract_strided_slice %3 {offsets = [7, 0, 0], sizes = [1, 2, 256], strides = [1, 1, 1]} : vector<8x2x256xf32> to vector<1x2x256xf32>
    %440 = vector.shape_cast %439 : vector<1x2x256xf32> to vector<2x256xf32>
    %441 = vector.broadcast %438 : f32 to vector<2x256xf32>
    %442 = arith.mulf %441, %440 : vector<2x256xf32>
    %443 = arith.addf %436, %442 : vector<2x256xf32>
    %444 = vector.shape_cast %58 : vector<2x256xf32> to vector<1x2x256xf32>
    %445 = vector.shape_cast %113 : vector<2x256xf32> to vector<1x2x256xf32>
    %446 = vector.shape_cast %168 : vector<2x256xf32> to vector<1x2x256xf32>
    %447 = vector.shape_cast %223 : vector<2x256xf32> to vector<1x2x256xf32>
    %448 = vector.shape_cast %278 : vector<2x256xf32> to vector<1x2x256xf32>
    %449 = vector.shape_cast %333 : vector<2x256xf32> to vector<1x2x256xf32>
    %450 = vector.shape_cast %388 : vector<2x256xf32> to vector<1x2x256xf32>
    %451 = vector.shape_cast %443 : vector<2x256xf32> to vector<1x2x256xf32>
    %452 = tpu.concatenate %444, %445, %446, %447, %448, %449, %450, %451 in 0 : vector<1x2x256xf32>, vector<1x2x256xf32>, vector<1x2x256xf32>, vector<1x2x256xf32>, vector<1x2x256xf32>, vector<1x2x256xf32>, vector<1x2x256xf32>, vector<1x2x256xf32> -> vector<8x2x256xf32>
    %453 = arith.truncf %452 : vector<8x2x256xf32> to vector<8x2x256xbf16>
    %c0_4 = arith.constant 0 : index
    %c0_5 = arith.constant 0 : index
    %c0_6 = arith.constant 0 : index
    %c0_7 = arith.constant 0 : index
    %454 = vector.load %arg3[%c0_4, %c0_5, %c0_6, %c0_7] : memref<1x8x256x256xbf16, #tpu.memory_space<vmem>>, vector<1x8x256x256xbf16>
    %455 = vector.shape_cast %454 : vector<1x8x256x256xbf16> to vector<8x256x256xbf16>
    "tpu.trace_start"() <{level = 10 : i32, message = "cbp,cpq->cbq"}> : () -> ()
    %cst = arith.constant dense<0.000000e+00> : vector<8x2x256xf32>
    %456 = tpu.matmul %453, %455, %cst {dimension_numbers = #tpu.dot_dimension_numbers<[2], [1], [1], [2], [0, 0, 0, 1, 1, 2], [0], [0]>} : vector<8x2x256xbf16>, vector<8x256x256xbf16>, vector<8x2x256xf32> -> vector<8x2x256xf32>
    %c0_i32_8 = arith.constant 0 : i32
    "tpu.trace_stop"() : () -> ()
    %457 = arith.cmpi sgt, %arg0, %c0_i32_8 : i32
    %458 = arith.extui %457 : i1 to i32
    %459 = arith.sitofp %458 : i32 to f32
    %460 = vector.broadcast %459 : f32 to vector<8x2x256xf32>
    %461 = arith.mulf %460, %3 : vector<8x2x256xf32>
    %462 = arith.addf %456, %461 : vector<8x2x256xf32>
    %c0_9 = arith.constant 0 : index
    %c0_10 = arith.constant 0 : index
    %c0_11 = arith.constant 0 : index
    %463 = vector.load %arg8[%c0_9, %c0_10, %c0_11] : memref<8x2x256xf32, #tpu.memory_space<vmem>>, vector<8x2x256xf32>
    tpu.vector_store %arg8[%c0_9, %c0_10, %c0_11], %462 {strides = array<i32>} : memref<8x2x256xf32, #tpu.memory_space<vmem>>, vector<8x2x256xf32>,
    %c2_i32 = arith.constant 2 : i32
    %464 = arith.cmpi eq, %arg0, %c2_i32 : i32
    %465 = arith.extui %464 : i1 to i32
    %c0_i32_12 = arith.constant 0 : i32
    %466 = arith.cmpi ne, %465, %c0_i32_12 : i32
    scf.if %466 {
      %c0_13 = arith.constant 0 : index
      %c0_14 = arith.constant 0 : index
      %c0_15 = arith.constant 0 : index
      %467 = vector.load %arg6[%c0_13, %c0_14, %c0_15] : memref<8x2x256xf32, #tpu.memory_space<vmem>>, vector<8x2x256xf32>
      tpu.vector_store %arg6[%c0_13, %c0_14, %c0_15], %462 {strides = array<i32>} : memref<8x2x256xf32, #tpu.memory_space<vmem>>, vector<8x2x256xf32>,
      %cst_16 = arith.constant dense<0.000000e+00> : vector<8x2xf32>
      %468 = vector.multi_reduction <add>, %462, %cst_16 [2] : vector<8x2x256xf32> to vector<8x2xf32>
      %cst_17 = arith.constant 3.906250e-03 : f32
      %469 = vector.broadcast %cst_17 : f32 to vector<8x2xf32>
      %470 = arith.mulf %468, %469 : vector<8x2xf32>
      %c0_18 = arith.constant 0 : index
      %c0_19 = arith.constant 0 : index
      %471 = vector.load %arg4[%c0_18, %c0_19] : memref<3x8xf32, #tpu.memory_space<vmem>>, vector<3x8xf32>
      %cst_20 = arith.constant dense<0.000000e+00> : vector<3x2xf32>
      %472 = tpu.matmul %471, %470, %cst_20 {dimension_numbers = #tpu.dot_dimension_numbers<[1], [0], [0], [1], [0, 0, 1, 1], [], []>} : vector<3x8xf32>, vector<8x2xf32>, vector<3x2xf32> -> vector<3x2xf32>
      %c0_21 = arith.constant 0 : index
      %c0_22 = arith.constant 0 : index
      %473 = vector.load %arg5[%c0_21, %c0_22] : memref<3x1xf32, #tpu.memory_space<vmem>>, vector<3x1xf32>
      %474 = vector.broadcast %473 : vector<3x1xf32> to vector<3x2xf32>
      %475 = arith.addf %472, %474 : vector<3x2xf32>
      %c0_23 = arith.constant 0 : index
      %c0_24 = arith.constant 0 : index
      %476 = vector.load %arg7[%c0_23, %c0_24] : memref<3x2xf32, #tpu.memory_space<vmem>>, vector<3x2xf32>
      tpu.vector_store %arg7[%c0_23, %c0_24], %475 {strides = array<i32>} : memref<3x2xf32, #tpu.memory_space<vmem>>, vector<3x2xf32>,
    } else {
    }
    return
  }
  func.func @transform_0(%arg0: i32, %arg1: memref<3x64xf32, #tpu.memory_space<smem>>) -> (i32, i32, i32) {
    %c0_i32 = arith.constant 0 : i32
    %c0_i32_0 = arith.constant 0 : i32
    %c0_i32_1 = arith.constant 0 : i32
    %c0_i32_2 = arith.constant 0 : i32
    return %c0_i32, %c0_i32_0, %c0_i32_1 : i32, i32, i32
  }
  func.func @transform_1(%arg0: i32, %arg1: memref<3x64xf32, #tpu.memory_space<smem>>) -> (i32, i32, i32, i32) {
    %c0_i32 = arith.constant 0 : i32
    %c0_i32_0 = arith.constant 0 : i32
    %c0_i32_1 = arith.constant 0 : i32
    %c0_i32_2 = arith.constant 0 : i32
    return %arg0, %c0_i32, %c0_i32_0, %c0_i32_1 : i32, i32, i32, i32
  }
  func.func @transform_2(%arg0: i32, %arg1: memref<3x64xf32, #tpu.memory_space<smem>>) -> (i32, i32) {
    %c0_i32 = arith.constant 0 : i32
    %c0_i32_0 = arith.constant 0 : i32
    %c0_i32_1 = arith.constant 0 : i32
    return %c0_i32, %c0_i32_0 : i32, i32
  }
  func.func @transform_3(%arg0: i32, %arg1: memref<3x64xf32, #tpu.memory_space<smem>>) -> (i32, i32) {
    %c0_i32 = arith.constant 0 : i32
    %c0_i32_0 = arith.constant 0 : i32
    %c0_i32_1 = arith.constant 0 : i32
    return %c0_i32, %c0_i32_0 : i32, i32
  }
  func.func @transform_4(%arg0: i32, %arg1: memref<3x64xf32, #tpu.memory_space<smem>>) -> (i32, i32, i32) {
    %c0_i32 = arith.constant 0 : i32
    %c0_i32_0 = arith.constant 0 : i32
    %c0_i32_1 = arith.constant 0 : i32
    %c0_i32_2 = arith.constant 0 : i32
    return %c0_i32, %c0_i32_0, %c0_i32_1 : i32, i32, i32
  }
  func.func @transform_5(%arg0: i32, %arg1: memref<3x64xf32, #tpu.memory_space<smem>>) -> (i32, i32) {
    %c0_i32 = arith.constant 0 : i32
    %c0_i32_0 = arith.constant 0 : i32
    %c0_i32_1 = arith.constant 0 : i32
    return %c0_i32, %c0_i32_0 : i32, i32
  }
}

</mosaic_0001>

<bundles_post_ra>
// kernel: gnn_forward.1
= control target key start
LH: loop header
LB: loop body
LE: loop exit
PB: predicated region body
PF: predicated region fallthrough
CT: control target
= control target key end

     0   :  { %s4892_s0 = inlined_call_operand.hbm [shape: f32[3,64], index: 0, kind: input, shape index: {}]   ;;  %s4893_s1 = inlined_call_operand.vmem [shape: f32[8,2,256], index: 1, kind: input, shape index: {}]   ;;  %s4894_s2 = inlined_call_operand.hbm [shape: bf16[3,8,256,256], index: 2, kind: input, shape index: {}]   ;;  %s4895_s3 = inlined_call_operand.hbm [shape: f32[3,8], index: 3, kind: input, shape index: {}]   ;;  %s4896_s4 = inlined_call_operand.vmem [shape: f32[3,1], index: 4, kind: input, shape index: {}]   ;;  %s4897_s5 = inlined_call_operand.vmem [shape: f32[8,2,256], index: 5, kind: output, shape index: {0}]   ;;  %s4898_s6 = inlined_call_operand.vmem [shape: f32[3,2], index: 6, kind: output, shape index: {1}]  }
   0x1   :  { %4910 = sst [smem:[#allocation17_spill]] %s4893_s1  ;;  %s3752_s23 = scalar_lea.hbm %s4892_s0, 64 }
   0x2   :  { %4911 = sst [smem:[#allocation18_spill]] %s4894_s2  ;;  %p3753_p0 = scmp.ne.s32.totalorder %s4892_s0, %s3752_s23 }
   0x3   :  { %4912 = sst [smem:[#allocation19_spill]] %s4895_s3  ;;  %p3756_p1 = scmp.lt.u32.totalorder %s3752_s23, %s4892_s0 }
   0x4   :  { %4913 = sst [smem:[#allocation20_spill]] %s4896_s4 }
   0x5   :  { %4914 = sst [smem:[#allocation21_spill]] %s4897_s5  ;;  %p3758_p2 = pnand %p3756_p1, %p3753_p0 }
   0x6   :  { %4915 = sst [smem:[#allocation22_spill]] %s4898_s6 }
   0x7   :  { %3761 = shalt.err (!%p3758_p2)  }
   0x8   :  { %s3862_s28 = smov [#allocation4]  }
   0x9   :  { %13 = dma.hbm_to_smem %s4892_s0, 64, %s3862_s28, [#allocation3] }
   0xa   :  { %3836 = dma.done.wait [#allocation3], 64 }
   0xb   :  { %3837 = vsyncadd [#allocation3], 4294967232 }
   0xc   :  { %15 = sfence }
   0xd   :  { %16 = vsyncpa [#allocation6], 0 }
   0xe   :  { %18 = vsyncpa [#allocation6 + $0x1], 0 }
   0xf   :  { %19 = vsyncpa [#allocation8], 0  ;;  %s3918_s7 = smov 0   ;;  %s3920_s8 = smov 0  }
  0x10   :  { %s3922_s9 = smov 0   ;;  %s3924_s10 = smov 0  }
  0x11 LB: > { %4916 = sst [smem:[#allocation12_spill]] %s3852_s8  ;;  %s3937_s0 = sadd.s32 4294967295, %s3860_s10   ;;  %s3860_s10 = sphi %s3924_s10, %s4939_s10   ;;  %s3856_s9 = sphi %s3922_s9, %s4942_s9   ;;  %s3852_s8 = sphi %s3920_s8, %s4941_s8   ;;  %s3848_s7 = sphi %s3918_s7, %s4940_s7  }
  0x12   : > { %4917 = sst [smem:[#allocation13_spill]] %s3856_s9  ;;  %s3940_s11 = sadd.s32 1, %s3860_s10  }
  0x13   : > { %4918 = sst [smem:[#allocation14_spill]] %s3937_s0  ;;  %s50_s12 = ssub.s32 %s3860_s10, %s3940_s11 }
  0x14   : > { %4919 = sst [smem:[#allocation15_spill]] %s3940_s11  ;;  %s53_s13 = sadd.s32 1, %s3856_s9 }
  0x15   : > { %p51_p3 = scmp.eq.s32.totalorder %s50_s12, 0  ;;  %p60_p4 = scmp.ne.s32.totalorder %s3856_s9, %s3852_s8 }
  0x16   : > { %p61_p5 = scmp.eq.s32.totalorder %s3860_s10, 0  ;;  %p66_p6 = scmp.ne.s32.totalorder %s3852_s8, %s3848_s7 }
  0x17   : > { %s3950_s14 = scalar_select %p51_p3, %s3856_s9, %s53_s13  }
  0x18   : > { %p3952_p7 = por %p61_p5, %p60_p4  ;;  %p4899_p8 = scmp.eq.s32.totalorder %s3937_s0, 0 }
  0x19   : > { %4920 = sst [smem:[#allocation16_spill]] %s3950_s14  ;;  %p3007_p9 = scmp.ge.s32.totalorder %s3860_s10, 1 }
  0x1a   : > { %p161_p10 = scmp.lt.s32.totalorder %s3860_s10, 4  ;;  %p3961_p11 = por %p4899_p8, %p66_p6 }
  0x1b   : > { %s3863_s18 = smov [#allocation7]   ;;  %p3317_p1 = scmp.lt.s32.totalorder %s3860_s10, 3 }
  0x1c   : > { %s4922_s16 = scalar_select %p3961_p11, 1, 0 }
  0x1d   : > { %p3966_p13 = pnand %p3007_p9, %p161_p10  ;;  %s177_s19 = sshll.u32 %s3863_s18, 4  ;;  %s178_s19 = int_to_ptr.vmem [resolvable:$true] %s177_s19 }
  0x1e   : > { %s191_s20 = sand.u32 1, %s3856_s9   ;;  %p3982_p3 = pnand %p3317_p1, %p3952_p7 }
  0x1f   : > { %s4923_s17 = scalar_select %p3966_p13, 1, 0 }
  0x20   : > { %p3308_p0 = pneg %p3966_p13  ;;  %s3010_s23 = sshll.u32 %s191_s20, 11 }
  0x21   : > { %s4925_s22 = scalar_select %p3982_p3, 1, 0 }
  0x22   : > { %p3976_p2 = pnand %p3308_p0, %p4899_p8  ;;  %s4926_s3 = sld [smem:[#allocation19_spill]] }
  0x24   : > { %p3764_p5 = pneg %p3976_p2 }
  0x28   : > { %s3762_s26 = scalar_lea.hbm %s4926_s3, 64 }
  0x29   : > { %p3763_p4 = scmp.ne.s32.totalorder %s4926_s3, %s3762_s26  ;;  %p3769_p7 = scmp.lt.u32.totalorder %s3762_s26, %s4926_s3 }
  0x2b   : > { %p3765_p6 = pnand %p3764_p5, %p3763_p4 }
  0x2d   : > { %p3766_p9 = pneg %p3765_p6 }
  0x2f   : > { %p3771_p10 = pnand %p3769_p7, %p3766_p9 }
  0x31   : > { %3774 = shalt.err (!%p3771_p10)
}
  0x32   : > { %s3775_s7 = scalar_lea.vmem %s178_s19, 64  ;;  %p3783_p8 = scmp.lt.s32.totalorder %s178_s19, %s178_s19 }
  0x33   : > { %p3776_p0 = scmp.ne.s32.totalorder %s178_s19, %s3775_s7  ;;  %p3784_p11 = scmp.lt.s32.totalorder %s3775_s7, %s3775_s7 }
  0x35   : > { %p3778_p1 = pnand %p3776_p0, %p3764_p5  ;;  %p3785_p13 = por %p3784_p11, %p3783_p8 }
  0x37   : > { %p3779_p12 = pneg %p3778_p1 }
  0x39   : > { %p3786_p3 = pnand %p3785_p13, %p3779_p12 }
  0x3b   : > { %3789 = shalt.err (!%p3786_p3)
}
  0x3c   : > { %3311 = dma.hbm_to_vmem [thread:$0]  (!%p3976_p2), %s4926_s3, 64, %s178_s19, [#allocation8]  }
  0x3d   : > { %s3294_s15 = sshll.u32 %s3860_s10, 15  ;;  %s4927_s2 = sld [smem:[#allocation18_spill]] }
  0x3e   : > { %s195_s26 = scalar_lea.vmem [#allocation5], %s3010_s23  ;;  %s4010_s21 = scalar_lea.sflag [#allocation6], %s191_s20 }
  0x3f   : > { %s202_s27 = sshll.u32 %s195_s26, 4  ;;  %p4928_p11 = scmp.ne.s32.totalorder %s4925_s22, 0  ;;  %s4008_s27 = int_to_ptr.vmem [resolvable:$true] %s202_s27 }
  0x41   : > { %p3792_p12 = pneg %p4928_p11 }
  0x43   : > { %s4006_s25 = scalar_lea.hbm %s4927_s2, %s3294_s15  ;;  %s3795_s29 = scalar_lea.hbm %s4927_s2, 98304 }
  0x44   : > { %s3790_s28 = scalar_lea.hbm %s4006_s25, 32768  ;;  %p3796_p3 = scmp.lt.u32.totalorder %s4006_s25, %s4927_s2 }
  0x45   : > { %p3791_p8 = scmp.ne.s32.totalorder %s4006_s25, %s3790_s28  ;;  %p3797_p4 = scmp.lt.u32.totalorder %s3795_s29, %s3790_s28 }
  0x46   : > { %p3799_p6 = scmp.lt.u32.totalorder %s3790_s28, %s4006_s25 }
  0x47   : > { %p3793_p13 = pnand %p3792_p12, %p3791_p8  ;;  %p3798_p5 = por %p3797_p4, %p3796_p3 }
  0x49   : > { %p3794_p2 = pneg %p3793_p13  ;;  %p3800_p9 = por %p3799_p6, %p3798_p5 }
  0x4b   : > { %p3801_p7 = pnand %p3800_p9, %p3794_p2 }
  0x4d   : > { %3804 = shalt.err (!%p3801_p7)
}
  0x4e   : > { %s3805_s20 = scalar_lea.vmem %s4008_s27, 32768  ;;  %s3864_s23 = smov [#allocation5]  }
  0x4f   : > { %p3806_p10 = scmp.ne.s32.totalorder %s4008_s27, %s3805_s20  ;;  %s3810_s12 = sshll.u32 %s3864_s23, 4  ;;  %s3811_s12 = int_to_ptr.vmem [resolvable:$false] %s3810_s12 }
  0x50   : > { %s3812_s13 = scalar_lea.vmem %s3811_s12, 65536  ;;  %p3813_p8 = scmp.lt.s32.totalorder %s4008_s27, %s3811_s12 }
  0x51   : > { %p3808_p0 = pnand %p3806_p10, %p3792_p12  ;;  %p3814_p13 = scmp.lt.s32.totalorder %s3812_s13, %s3805_s20 }
  0x53   : > { %p3809_p1 = pneg %p3808_p0  ;;  %p3815_p3 = por %p3814_p13, %p3813_p8 }
  0x55   : > { %p3816_p4 = pnand %p3815_p3, %p3809_p1 }
  0x57   : > { %3819 = shalt.err (!%p3816_p4)
}
  0x58   : > { %s3865_s15 = smov 128   ;;  %s3866_s18 = smov 8  }
  0x59   : > { %3315 = dma.hbm_to_vmem [thread:$0]  (!%p4928_p11), %s4006_s25, 32768, %s4008_s27, %s4010_s21, %s3865_s15, %s3865_s15, %s3866_s18  }
  0x5a   : > { %p4929_p12 = scmp.ne.s32.totalorder %s4923_s17, 0 }
  0x5b   : > { %s216_s24 = sand.u32 (!%p4929_p12), 1, %s3852_s8   ;;  %p4930_p2 = scmp.ne.s32.totalorder (!%p4929_p12), %s4922_s16, 0 }
  0x5c   : > { %214 = sbr.rel (%p4929_p12) target bundleno = 953 (0x3b9), region = 36  ;;  %s3014_s26 = sshll.u32 (!%p4929_p12), %s216_s24, 11 }
  0x5d   : > { %s217_s28 = scalar_lea.sflag (!%p4929_p12), [#allocation6], %s216_s24  ;;  %s4041_s10 = scalar_lea.vmem (!%p4929_p12), [#allocation5], %s3014_s26 }
  0x63   : > { %3839 = dma.done.wait (%p4930_p2), %s217_s28, 32768  }
  0x64   : > { %3841 = vsyncadd (%p4930_p2), %s217_s28, 4294934528  ;;  %p4931_p5 = scmp.eq.s32.totalorder %s3937_s0, 0 }
  0x66   : > { %3843 = dma.done.wait (%p4931_p5), [#allocation8], 64   ;;  %p4932_p11 = pmov %p4931_p5 }
  0x67   : > { %p4933_p6 = scmp.ne.s32.totalorder %s3937_s0, 0 }
  0x68   : > { %3845 = vsyncadd (%p4932_p11), [#allocation8], 4294967232  ;;  %s4934_s1 = sld [smem:[#allocation17_spill]] (!%p4933_p6) }
  0x69   : > { %249 = sbr.rel (%p4933_p6) target bundleno = 113 (0x71), region = 48 }
  0x6e   : > { %v250_v0 = vld [vmem:[%s4934_s1] sm:$0xff] (!%p4933_p6)   ;;  %v252_v1 = vld [vmem:[%s4934_s1 + $0x8] sm:$0xff] (!%p4933_p6)   ;;  %v254_v2 = vld [vmem:[%s4934_s1 + $0x10] sm:$0xff] (!%p4933_p6)  }
  0x6f   : > { %258 = vst [vmem:[#allocation2] sm:$0xff] (!%p4933_p6), %v250_v0   ;;  %260 = vst [vmem:[#allocation2 + $0x8] sm:$0xff] (!%p4933_p6), %v252_v1   ;;  %v256_v3 = vld [vmem:[%s4934_s1 + $0x18] sm:$0xff] (!%p4933_p6)  }
  0x70   : > { %262 = vst [vmem:[#allocation2 + $0x10] sm:$0xff] %v254_v2   ;;  %264 = vst [vmem:[#allocation2 + $0x18] sm:$0xff] %v256_v3  }
  0x71 PF: > { %v3359_v4 = vld [vmem:[%s4041_s10 + $0x4] ss:$8 sps:$4 sm:$0xff]   ;;  %v3363_v6 = vld [vmem:[%s4041_s10] ss:$8 sps:$4 sm:$0xff]   ;;  %v3365_v8 = vld [vmem:[%s4041_s10 + $0x14] ss:$8 sps:$4 sm:$0xff]   ;;  %v597_v51 = vlaneseq }
  0x72   : > { %v3361_v5 = vld [vmem:[%s4041_s10 + $0x104] ss:$8 sps:$4 sm:$0xff]   ;;  %1129 = vmatprep.subr.bf16.mxu0 %v3359_v4  ;;  %v3364_v7 = vld [vmem:[%s4041_s10 + $0x100] ss:$8 sps:$4 sm:$0xff]   ;;  %v3367_v9 = vld [vmem:[%s4041_s10 + $0x114] ss:$8 sps:$4 sm:$0xff]  }
  0x73   : > { %1341 = vmatprep.subr.bf16.mxu1 %v3361_v5  ;;  %1130 = vmatpush1.bf16.msra.mxu0 %v3363_v6  ;;  %v3369_v10 = vld [vmem:[%s4041_s10 + $0x10] ss:$8 sps:$4 sm:$0xff]   ;;  %v3371_v12 = vld [vmem:[%s4041_s10 + $0x24] ss:$8 sps:$4 sm:$0xff]   ;;  %v3375_v14 = vld [vmem:[%s4041_s10 + $0x20] ss:$8 sps:$4 sm:$0xff]  }
  0x74   : > { %1342 = vmatpush1.bf16.msra.mxu1 %v3364_v7  ;;  %1131 = vmatprep.subr.bf16.mxu0 %v3365_v8  ;;  %v3370_v11 = vld [vmem:[%s4041_s10 + $0x110] ss:$8 sps:$4 sm:$0xff]   ;;  %v3373_v13 = vld [vmem:[%s4041_s10 + $0x124] ss:$8 sps:$4 sm:$0xff]   ;;  %v3376_v15 = vld [vmem:[%s4041_s10 + $0x120] ss:$8 sps:$4 sm:$0xff]  }
  0x75   : > { %1343 = vmatprep.subr.bf16.mxu1 %v3367_v9  ;;  %v3377_v16 = vld [vmem:[%s4041_s10 + $0x34] ss:$8 sps:$4 sm:$0xff]   ;;  %s4079_s30 = sshll.u32 %s3937_s0, 7  ;;  %v3381_v18 = vld [vmem:[%s4041_s10 + $0x30] ss:$8 sps:$4 sm:$0xff]   ;;  %v4197_v60 = vshrl.u32 %v597_v51, 7 }
  0x76   : > { %v3379_v17 = vld [vmem:[%s4041_s10 + $0x134] ss:$8 sps:$4 sm:$0xff]   ;;  %s278_s7 = sadd.s32 1, %s4079_s30  ;;  %v3382_v19 = vld [vmem:[%s4041_s10 + $0x130] ss:$8 sps:$4 sm:$0xff]   ;;  %s4088_s20 = sld [smem:[#allocation4 + %s4079_s30]] }
  0x77   : > { %1132 = vmatpush1.bf16.msra.mxu0 %v3369_v10  ;;  %v3383_v20 = vld [vmem:[%s4041_s10 + $0x44] ss:$8 sps:$4 sm:$0xff]   ;;  %s283_s23 = sadd.s32 2, %s4079_s30  ;;  %s4091_s12 = sld [smem:[#allocation4 + %s278_s7]]  ;;  %v3387_v22 = vld [vmem:[%s4041_s10 + $0x40] ss:$8 sps:$4 sm:$0xff]  }
  0x78   : > { %1344 = vmatpush1.bf16.msra.mxu1 %v3370_v11  ;;  %1133 = vmatprep.subr.bf16.mxu0 %v3371_v12  ;;  %v3385_v21 = vld [vmem:[%s4041_s10 + $0x144] ss:$8 sps:$4 sm:$0xff]   ;;  %s288_s13 = sadd.s32 3, %s4079_s30  ;;  %v3388_v23 = vld [vmem:[%s4041_s10 + $0x140] ss:$8 sps:$4 sm:$0xff]   ;;  %s293_s15 = sadd.s32 4, %s4079_s30 }
  0x79   : > { %1345 = vmatprep.subr.bf16.mxu1 %v3373_v13  ;;  %s298_s18 = sadd.s32 5, %s4079_s30  ;;  %v3389_v24 = vld [vmem:[%s4041_s10 + $0x54] ss:$8 sps:$4 sm:$0xff]   ;;  %s4099_s24 = sld [smem:[#allocation4 + %s283_s23]]  ;;  %v3393_v26 = vld [vmem:[%s4041_s10 + $0x50] ss:$8 sps:$4 sm:$0xff]  }
  0x7a   : > { %s303_s26 = sadd.s32 6, %s4079_s30  ;;  %v3391_v25 = vld [vmem:[%s4041_s10 + $0x154] ss:$8 sps:$4 sm:$0xff]   ;;  %s4103_s28 = sld [smem:[#allocation4 + %s288_s13]]  ;;  %v3394_v27 = vld [vmem:[%s4041_s10 + $0x150] ss:$8 sps:$4 sm:$0xff]  }
  0x7b   : > { %1134 = vmatpush1.bf16.msra.mxu0 %v3375_v14  ;;  %s308_s17 = sadd.s32 7, %s4079_s30  ;;  %s4106_s22 = sld [smem:[#allocation4 + %s293_s15]]  ;;  %v3395_v28 = vld [vmem:[%s4041_s10 + $0x64] ss:$8 sps:$4 sm:$0xff]   ;;  %v3399_v30 = vld [vmem:[%s4041_s10 + $0x60] ss:$8 sps:$4 sm:$0xff]  }
  0x7c   : > { %1346 = vmatpush1.bf16.msra.mxu1 %v3376_v15  ;;  %1135 = vmatprep.subr.bf16.mxu0 %v3377_v16  ;;  %s4108_s25 = sld [smem:[#allocation4 + %s298_s18]]  ;;  %s313_s21 = sadd.s32 8, %s4079_s30  ;;  %v3397_v29 = vld [vmem:[%s4041_s10 + $0x164] ss:$8 sps:$4 sm:$0xff]   ;;  %v3400_v31 = vld [vmem:[%s4041_s10 + $0x160] ss:$8 sps:$4 sm:$0xff]   ;;  %v276_v40 = vstv %s4088_s20 }
  0x7d   : > { %1347 = vmatprep.subr.bf16.mxu1 %v3379_v17  ;;  %s4111_s27 = sld [smem:[#allocation4 + %s303_s26]]  ;;  %s317_s19 = sadd.s32 9, %s4079_s30  ;;  %v3401_v32 = vld [vmem:[%s4041_s10 + $0x74] ss:$8 sps:$4 sm:$0xff]   ;;  %v3405_v34 = vld [vmem:[%s4041_s10 + $0x70] ss:$8 sps:$4 sm:$0xff]   ;;  %v280_v41 = vstv %s4091_s12 }
  0x7e   : > { %s4116_s16 = sld [smem:[#allocation4 + %s308_s17]]  ;;  %s322_s29 = sadd.s32 10, %s4079_s30  ;;  %v3403_v33 = vld [vmem:[%s4041_s10 + $0x174] ss:$8 sps:$4 sm:$0xff]   ;;  %v3406_v35 = vld [vmem:[%s4041_s10 + $0x170] ss:$8 sps:$4 sm:$0xff]  }
  0x7f   : > { %1136 = vmatpush1.bf16.msra.mxu0 %v3381_v18  ;;  %s4121_s7 = sld [smem:[#allocation4 + %s313_s21]]  ;;  %s327_s23 = sadd.s32 11, %s4079_s30  ;;  %v3407_v36 = vld [vmem:[%s4041_s10 + $0x84] ss:$8 sps:$4 sm:$0xff]   ;;  %v3411_v38 = vld [vmem:[%s4041_s10 + $0x80] ss:$8 sps:$4 sm:$0xff]   ;;  %v285_v43 = vstv %s4099_s24 }
  0x80   : > { %1348 = vmatpush1.bf16.msra.mxu1 %v3382_v19  ;;  %1137 = vmatprep.subr.bf16.mxu0 %v3383_v20  ;;  %s332_s13 = sadd.s32 12, %s4079_s30  ;;  %s337_s15 = sadd.s32 13, %s4079_s30  ;;  %v3409_v37 = vld [vmem:[%s4041_s10 + $0x184] ss:$8 sps:$4 sm:$0xff]   ;;  %v3412_v39 = vld [vmem:[%s4041_s10 + $0x180] ss:$8 sps:$4 sm:$0xff]   ;;  %v290_v45 = vstv %s4103_s28 }
  0x81   : > { %1349 = vmatprep.subr.bf16.mxu1 %v3385_v21  ;;  %s4129_s18 = sld [smem:[#allocation4 + %s317_s19]]  ;;  %s342_s21 = sadd.s32 14, %s4079_s30  ;;  %v3413_v42 = vld [vmem:[%s4041_s10 + $0x94] ss:$8 sps:$4 sm:$0xff]   ;;  %v3417_v46 = vld [vmem:[%s4041_s10 + $0x90] ss:$8 sps:$4 sm:$0xff]   ;;  %v295_v47 = vstv %s4106_s22 }
  0x82   : > { %s4131_s26 = sld [smem:[#allocation4 + %s322_s29]]  ;;  %s347_s19 = sadd.s32 15, %s4079_s30  ;;  %v3415_v44 = vld [vmem:[%s4041_s10 + $0x194] ss:$8 sps:$4 sm:$0xff]   ;;  %v300_v48 = vstv %s4108_s25  ;;  %v3867_v49 = vmov 1983009808  }
  0x83   : > { %1138 = vmatpush1.bf16.msra.mxu0 %v3387_v22  ;;  %s4134_s17 = sld [smem:[#allocation4 + %s327_s23]]  ;;  %s352_s29 = sadd.s32 16, %s4079_s30  ;;  %v595_v50 = vunpack.c.l.s4 %v3867_v49  ;;  %v3418_v52 = vld [vmem:[%s4041_s10 + $0x190] ss:$8 sps:$4 sm:$0xff]   ;;  %v305_v53 = vstv %s4111_s27  ;;  %v3419_v54 = vld [vmem:[%s4041_s10 + $0xa4] ss:$8 sps:$4 sm:$0xff]  }
  0x84   : > { %1350 = vmatpush1.bf16.msra.mxu1 %v3388_v23  ;;  %1139 = vmatprep.subr.bf16.mxu0 %v3389_v24  ;;  %s4138_s1 = sld [smem:[#allocation4 + %s332_s13]]  ;;  %s356_s3 = sadd.s32 17, %s4079_s30  ;;  %v310_v55 = vstv %s4116_s16  ;;  %v3421_v57 = vld [vmem:[%s4041_s10 + $0x1a4] ss:$8 sps:$4 sm:$0xff]   ;;  %v3423_v63 = vld [vmem:[%s4041_s10 + $0xa0] ss:$8 sps:$4 sm:$0xff]  }
  0x85   : > { %1351 = vmatprep.subr.bf16.mxu1 %v3391_v25  ;;  %s4140_s2 = sld [smem:[#allocation4 + %s337_s15]]  ;;  %s361_s13 = sadd.s32 18, %s4079_s30  ;;  %v315_v56 = vstv %s4121_s7  ;;  %v596_v59 = vunpack.c.0.s8 %v595_v50  ;;  %v3424_v0 = vld [vmem:[%s4041_s10 + $0x1a0] ss:$8 sps:$4 sm:$0xff]   ;;  %v3425_v3 = vld [vmem:[%s4041_s10 + $0xb4] ss:$8 sps:$4 sm:$0xff]  }
  0x86   : > { %s4146_s23 = sld [smem:[#allocation4 + %s342_s21]]  ;;  %s366_s15 = sadd.s32 19, %s4079_s30  ;;  %v3427_v5 = vld [vmem:[%s4041_s10 + $0x1b4] ss:$8 sps:$4 sm:$0xff]   ;;  %v3429_v7 = vld [vmem:[%s4041_s10 + $0xb0] ss:$8 sps:$4 sm:$0xff]  }
  0x87   : > { %1140 = vmatpush1.bf16.msra.mxu0 %v3393_v26  ;;  %s4152_s14 = sld [smem:[#allocation4 + %s347_s19]]  ;;  %s371_s8 = sadd.s32 20, %s4079_s30  ;;  %v319_v58 = vstv %s4129_s18  ;;  %v3430_v8 = vld [vmem:[%s4041_s10 + $0x1b0] ss:$8 sps:$4 sm:$0xff]   ;;  %v4218_v9 = vld [vmem:[#allocation2] sm:$0xf]  ;;  %v4221_v10 = vsub.s32 %v596_v59, %v4197_v60 }
  0x88   : > { %1352 = vmatpush1.bf16.msra.mxu1 %v3394_v27  ;;  %1141 = vmatprep.subr.bf16.mxu0 %v3395_v28  ;;  %s4154_s9 = sld [smem:[#allocation4 + %s352_s29]]  ;;  %s381_s11 = sadd.s32 22, %s4079_s30  ;;  %v324_v61 = vstv %s4131_s26  ;;  %v3431_v14 = vld [vmem:[%s4041_s10 + $0xc4] ss:$8 sps:$4 sm:$0xff]   ;;  %v4233_v17 = vld [vmem:[#allocation2 + $0x8] sm:$0xf]  ;;  %v277_v19 = vmul.f32 %v276_v40, %v4218_v9  ;;  %v316_v28 = vmul.f32 %v315_v56, %v4218_v9 }
  0x89   : > { %1353 = vmatprep.subr.bf16.mxu1 %v3397_v29  ;;  %s4160_s21 = sld [smem:[#allocation4 + %s356_s3]]  ;;  %s376_s3 = sadd.s32 21, %s4079_s30  ;;  %v329_v62 = vstv %s4134_s17  ;;  %v3433_v15 = vld [vmem:[%s4041_s10 + $0x1c4] ss:$8 sps:$4 sm:$0xff]   ;;  %v4243_v23 = vld [vmem:[#allocation2 + $0x10] sm:$0xf]  ;;  %v286_v27 = vmul.f32 %v285_v43, %v4233_v17 }
  0x8a   : > { %s4165_s19 = sld [smem:[#allocation4 + %s361_s13]]  ;;  %s395_s4 = sadd.s32 25, %s4079_s30  ;;  %v334_v1 = vstv %s4138_s1  ;;  %v4231_v16 = vld [vmem:[#allocation2 + $0x4] sm:$0xf]  ;;  %v4235_v18 = vld [vmem:[#allocation2 + $0xc] sm:$0xf] }
  0x8b   : > { %1142 = vmatpush1.bf16.msra.mxu0 %v3399_v30  ;;  %s4167_s29 = sld [smem:[#allocation4 + %s366_s15]]  ;;  %s391_s15 = sadd.s32 24, %s4079_s30  ;;  %v339_v2 = vstv %s4140_s2  ;;  %v4245_v24 = vld [vmem:[#allocation2 + $0x14] sm:$0xf]  ;;  %v4247_v25 = vld [vmem:[#allocation2 + $0x18] sm:$0xf]  ;;  %v281_v26 = vmul.f32 %v280_v41, %v4231_v16  ;;  %v296_v41 = vmul.f32 %v295_v47, %v4243_v23 }
  0x8c   : > { %1354 = vmatpush1.bf16.msra.mxu1 %v3400_v31  ;;  %1143 = vmatprep.subr.bf16.mxu0 %v3401_v32  ;;  %s4176_s13 = sld [smem:[#allocation4 + %s371_s8]]  ;;  %s400_s0 = sadd.s32 26, %s4079_s30  ;;  %v344_v4 = vstv %s4146_s23  ;;  %v4257_v30 = vld [vmem:[#allocation2 + $0x1c] sm:$0xf]  ;;  %v3436_v40 = vld [vmem:[%s4041_s10 + $0x1c0] ss:$8 sps:$4 sm:$0xff]   ;;  %v306_v43 = vmul.f32 %v305_v53, %v4247_v25 }
  0x8d   : > { %1355 = vmatprep.subr.bf16.mxu1 %v3403_v33  ;;  %s4181_s6 = sld [smem:[#allocation4 + %s391_s15]]  ;;  %s410_s7 = sadd.s32 28, %s4079_s30  ;;  %v349_v6 = vstv %s4152_s14  ;;  %v3439_v50 = vld [vmem:[%s4041_s10 + $0x1d4] ss:$8 sps:$4 sm:$0xff]   ;;  %v345_v59 = vmul.f32 %v344_v4, %v4247_v25 }
  0x8e   : > { %s4187_s8 = sld [smem:[#allocation4 + %s376_s3]]  ;;  %s386_s18 = sadd.s32 23, %s4079_s30  ;;  %v354_v11 = vstv %s4154_s9 }
  0x8f   : > { %1144 = vmatpush1.bf16.msra.mxu0 %v3405_v34  ;;  %s4189_s5 = sld [smem:[#allocation4 + %s381_s11]]  ;;  %s405_s11 = sadd.s32 27, %s4079_s30  ;;  %v358_v12 = vstv %s4160_s21  ;;  %v355_v31 = vmul.f32 %v354_v11, %v4218_v9  ;;  %v3445_v11 = vld [vmem:[%s4041_s10 + $0x1e4] ss:$8 sps:$4 sm:$0xff]  }
  0x90   : > { %1356 = vmatpush1.bf16.msra.mxu1 %v3406_v35  ;;  %1145 = vmatprep.subr.bf16.mxu0 %v3407_v36  ;;  %s4193_s15 = sld [smem:[#allocation4 + %s395_s4]]  ;;  %s415_s3 = sadd.s32 29, %s4079_s30  ;;  %v363_v20 = vstv %s4165_s19  ;;  %v282_v35 = vadd.f32 %v281_v26, %v277_v19  ;;  %v291_v36 = vmul.f32 %v290_v45, %v4235_v18  ;;  %v3437_v45 = vld [vmem:[%s4041_s10 + $0xd4] ss:$8 sps:$4 sm:$0xff]   ;;  %v359_v53 = vmul.f32 %v358_v12, %v4231_v16  ;;  %v3447_v26 = vld [vmem:[%s4041_s10 + $0xe0] ss:$8 sps:$4 sm:$0xff]  }
  0x91   : > { %1357 = vmatprep.subr.bf16.mxu1 %v3409_v37  ;;  %s4208_s4 = sld [smem:[#allocation4 + %s400_s0]]  ;;  %v368_v21 = vstv %s4167_s29  ;;  %s420_s9 = sadd.s32 30, %s4079_s30  ;;  %v320_v37 = vmul.f32 %v319_v58, %v4231_v16  ;;  %v340_v58 = vmul.f32 %v339_v2, %v4245_v24  ;;  %v3443_v2 = vld [vmem:[%s4041_s10 + $0xe4] ss:$8 sps:$4 sm:$0xff]  }
  0x92   : > { %s4214_s26 = sld [smem:[#allocation4 + %s405_s11]]  ;;  %v373_v22 = vstv %s4176_s13  ;;  %s425_s12 = sadd.s32 31, %s4079_s30 }
  0x93   : > { %1146 = vmatpush1.bf16.msra.mxu0 %v3411_v38  ;;  %v393_v13 = vstv %s4181_s6  ;;  %s4226_s0 = sld [smem:[#allocation4 + %s410_s7]]  ;;  %v325_v38 = vmul.f32 %v324_v61, %v4233_v17  ;;  %v321_v47 = vadd.f32 %v320_v37, %v316_v28  ;;  %v3441_v61 = vld [vmem:[%s4041_s10 + $0xd0] ss:$8 sps:$4 sm:$0xff]   ;;  %s430_s1 = sadd.s32 32, %s4079_s30 }
  0x94   : > { %1358 = vmatpush1.bf16.msra.mxu1 %v3412_v39  ;;  %1147 = vmatprep.subr.bf16.mxu0 %v3413_v42  ;;  %v378_v29 = vstv %s4187_s8  ;;  %s4263_s6 = sld [smem:[#allocation4 + %s386_s18]]  ;;  %v394_v33 = vmul.f32 %v393_v13, %v4218_v9  ;;  %v3435_v39 = vld [vmem:[%s4041_s10 + $0xc0] ss:$8 sps:$4 sm:$0xff]   ;;  %v301_v42 = vmul.f32 %v300_v48, %v4245_v24  ;;  %v330_v48 = vmul.f32 %v329_v62, %v4235_v18  ;;  %v3442_v62 = vld [vmem:[%s4041_s10 + $0x1d0] ss:$8 sps:$4 sm:$0xff]   ;;  %s434_s2 = sadd.s32 33, %s4079_s30 }
  0x95   : > { %1359 = vmatprep.subr.bf16.mxu1 %v3415_v44  ;;  %v383_v32 = vstv %s4189_s5  ;;  %s4275_s20 = sld [smem:[#allocation4 + %s415_s3]]  ;;  %v4291_v44 = vmul.f32 %v310_v55, %v4257_v30  ;;  %s469_s14 = sadd.s32 40, %s4079_s30 }
  0x96   : > { %v397_v34 = vstv %s4193_s15  ;;  %s4299_s24 = sld [smem:[#allocation4 + %s420_s9]]  ;;  %s473_s22 = sadd.s32 41, %s4079_s30 }
  0x97   : > { %1148 = vmatpush1.bf16.msra.mxu0 %v3417_v46  ;;  %v287_v46 = vadd.f32 %v286_v27, %v282_v35  ;;  %v402_v49 = vstv %s4208_s4  ;;  %s4314_s28 = sld [smem:[#allocation4 + %s425_s12]]  ;;  %v3448_v27 = vld [vmem:[%s4041_s10 + $0x1e0] ss:$8 sps:$4 sm:$0xff]   ;;  %v3449_v35 = vld [vmem:[%s4041_s10 + $0xf4] ss:$8 sps:$4 sm:$0xff]   ;;  %s439_s27 = sadd.s32 34, %s4079_s30 }
  0x98   : > { %1360 = vmatpush1.bf16.msra.mxu1 %v3418_v52  ;;  %1149 = vmatprep.subr.bf16.mxu0 %v3419_v54  ;;  %v335_v52 = vmul.f32 %v334_v1, %v4243_v23  ;;  %v364_v54 = vmul.f32 %v363_v20, %v4233_v17  ;;  %v407_v55 = vstv %s4214_s26  ;;  %v374_v1 = vmul.f32 %v373_v22, %v4243_v23  ;;  %s4379_s5 = sld [smem:[#allocation4 + %s430_s1]]  ;;  %s478_s23 = sadd.s32 42, %s4079_s30 }
  0x99   : > { %1361 = vmatprep.subr.bf16.mxu1 %v3421_v57  ;;  %v292_v56 = vadd.f32 %v291_v36, %v287_v46  ;;  %v326_v57 = vadd.f32 %v325_v38, %v321_v47  ;;  %v3453_v47 = vld [vmem:[%s4041_s10 + $0xf0] ss:$8 sps:$4 sm:$0xff]   ;;  %s4385_s25 = sld [smem:[#allocation4 + %s434_s2]]  ;;  %s444_s19 = sadd.s32 35, %s4079_s30 }
  0x9a   : > { %v388_v13 = vstv %s4263_s6  ;;  %s4390_s16 = sld [smem:[#allocation4 + %s469_s14]]  ;;  %s483_s13 = sadd.s32 43, %s4079_s30 }
  0x9b   : > { %1150 = vmatpush1.bf16.msra.mxu0 %v3423_v63  ;;  %v360_v63 = vadd.f32 %v359_v53, %v355_v31  ;;  %v297_v4 = vadd.f32 %v296_v41, %v292_v56  ;;  %v417_v22 = vstv %s4275_s20  ;;  %v379_v31 = vmul.f32 %v378_v29, %v4245_v24  ;;  %s4392_s17 = sld [smem:[#allocation4 + %s473_s22]]  ;;  %s449_s15 = sadd.s32 36, %s4079_s30 }
  0x9c   : > { %1362 = vmatpush1.bf16.msra.mxu1 %v3424_v0  ;;  %1151 = vmatprep.subr.bf16.mxu0 %v3425_v3  ;;  %v369_v0 = vmul.f32 %v368_v21, %v4235_v18  ;;  %v398_v3 = vmul.f32 %v397_v34, %v4231_v16  ;;  %v350_v21 = vmul.f32 %v349_v6, %v4257_v30  ;;  %v422_v38 = vstv %s4299_s24  ;;  %s4397_s21 = sld [smem:[#allocation4 + %s439_s27]]  ;;  %s488_s4 = sadd.s32 44, %s4079_s30 }
  0x9d   : > { %1363 = vmatprep.subr.bf16.mxu1 %v3427_v5  ;;  %v331_v5 = vadd.f32 %v330_v48, %v326_v57  ;;  %v365_v12 = vadd.f32 %v364_v54, %v360_v63  ;;  %v302_v19 = vadd.f32 %v301_v42, %v297_v4  ;;  %v384_v6 = vmul.f32 %v383_v32, %v4247_v25  ;;  %v3457_v54 = vld [vmem:[%s4041_s10 + $0x204] ss:$8 sps:$4 sm:$0xff]   ;;  %v3463_v4 = vld [vmem:[%s4041_s10 + $0x214] ss:$8 sps:$4 sm:$0xff]   ;;  %s4402_s29 = sld [smem:[#allocation4 + %s478_s23]]  ;;  %s454_s18 = sadd.s32 37, %s4079_s30 }
  0x9e   : > { %v418_v41 = vmul.f32 %v417_v22, %v4245_v24  ;;  %v427_v46 = vstv %s4314_s28  ;;  %v3464_v22 = vld [vmem:[%s4041_s10 + $0x310] ss:$8 sps:$4 sm:$0xff]   ;;  %s4409_s8 = sld [smem:[#allocation4 + %s444_s19]]  ;;  %s459_s6 = sadd.s32 38, %s4079_s30 }
  0x9f   : > { %1152 = vmatpush1.bf16.msra.mxu0 %v3429_v7  ;;  %v403_v7 = vmul.f32 %v402_v49, %v4233_v17  ;;  %v336_v20 = vadd.f32 %v335_v52, %v331_v5  ;;  %v370_v28 = vadd.f32 %v369_v0, %v365_v12  ;;  %v307_v36 = vadd.f32 %v306_v43, %v302_v19  ;;  %v3454_v43 = vld [vmem:[%s4041_s10 + $0x1f0] ss:$8 sps:$4 sm:$0xff]   ;;  %v3466_v12 = vld [vmem:[%s4041_s10 + $0x314] ss:$8 sps:$4 sm:$0xff]   ;;  %v3469_v19 = vld [vmem:[%s4041_s10 + $0x224] ss:$8 sps:$4 sm:$0xff]  }
  0xa0   : > { %1364 = vmatpush1.bf16.msra.mxu1 %v3430_v8  ;;  %1153 = vmatprep.subr.bf16.mxu0 %v3431_v14  ;;  %v412_v8 = vstv %s4226_s0  ;;  %v399_v14 = vadd.f32 %v398_v3, %v394_v33  ;;  %v389_v49 = vmul.f32 %v388_v13, %v4257_v30  ;;  %v428_v57 = vmul.f32 %v427_v46, %v4257_v30  ;;  %v3455_v3 = vld [vmem:[%s4041_s10 + $0x200] ss:$8 sps:$4 sm:$0xff]   ;;  %s4416_s11 = sld [smem:[#allocation4 + %s483_s13]]  ;;  %s493_s0 = sadd.s32 45, %s4079_s30 }
  0xa1   : > { %1365 = vmatprep.subr.bf16.mxu1 %v3433_v15  ;;  %v408_v15 = vmul.f32 %v407_v55, %v4235_v18  ;;  %v413_v33 = vmul.f32 %v412_v8, %v4243_v23  ;;  %v341_v37 = vadd.f32 %v340_v58, %v336_v20  ;;  %v312_v42 = vadd.f32 %v4291_v44, %v307_v36  ;;  %v3460_v44 = vld [vmem:[%s4041_s10 + $0x304] ss:$8 sps:$4 sm:$0xff]   ;;  %s4424_s7 = sld [smem:[#allocation4 + %s449_s15]]  ;;  %s498_s20 = sadd.s32 46, %s4079_s30 }
  0xa2   : > { %v404_v34 = vadd.f32 %v403_v7, %v399_v14  ;;  %v3481_v36 = vld [vmem:[%s4041_s10 + $0x244] ss:$8 sps:$4 sm:$0xff]   ;;  %v436_v46 = vstv %s4385_s25  ;;  %s4432_s26 = sld [smem:[#allocation4 + %s488_s4]]  ;;  %s464_s24 = sadd.s32 39, %s4079_s30 }
  0xa3   : > { %1154 = vmatpush1.bf16.msra.mxu0 %v3435_v39  ;;  %v3451_v39 = vld [vmem:[%s4041_s10 + $0x1f4] ss:$8 sps:$4 sm:$0xff]   ;;  %v600_v52 = vrot.slane %v312_v42, %v4221_v10  ;;  %v432_v42 = vstv %s4379_s5  ;;  %s4439_s3 = sld [smem:[#allocation4 + %s454_s18]]  ;;  %s503_s1 = sadd.s32 47, %s4079_s30 }
  0xa4   : > { %1366 = vmatpush1.bf16.msra.mxu1 %v3436_v40  ;;  %1155 = vmatprep.subr.bf16.mxu0 %v3437_v45  ;;  %v375_v40 = vadd.f32 %v374_v1, %v370_v28  ;;  %v409_v29 = vadd.f32 %v408_v15, %v404_v34  ;;  %v346_v45 = vadd.f32 %v345_v59, %v341_v37  ;;  %v3461_v15 = vld [vmem:[%s4041_s10 + $0x210] ss:$8 sps:$4 sm:$0xff]   ;;  %v3467_v28 = vld [vmem:[%s4041_s10 + $0x220] ss:$8 sps:$4 sm:$0xff]   ;;  %s4446_s9 = sld [smem:[#allocation4 + %s493_s0]]  ;;  %s508_s14 = sadd.s32 48, %s4079_s30 }
  0xa5   : > { %1367 = vmatprep.subr.bf16.mxu1 %v3439_v50  ;;  %v423_v50 = vmul.f32 %v422_v38, %v4247_v25  ;;  %v601_v58 = vcombine.high %v600_v52, %v600_v52  ;;  %v3470_v34 = vld [vmem:[%s4041_s10 + $0x320] ss:$8 sps:$4 sm:$0xff]   ;;  %v3476_v37 = vld [vmem:[%s4041_s10 + $0x330] ss:$8 sps:$4 sm:$0xff]   ;;  %s4453_s12 = sld [smem:[#allocation4 + %s459_s6]]  ;;  %s512_s22 = sadd.s32 49, %s4079_s30 }
  0xa6   : > { %v380_v48 = vadd.f32 %v379_v31, %v375_v40  ;;  %v414_v32 = vadd.f32 %v413_v33, %v409_v29  ;;  %v351_v53 = vadd.f32 %v350_v21, %v346_v45  ;;  %v3475_v31 = vld [vmem:[%s4041_s10 + $0x234] ss:$8 sps:$4 sm:$0xff]   ;;  %v3479_v38 = vld [vmem:[%s4041_s10 + $0x240] ss:$8 sps:$4 sm:$0xff]   ;;  %v3493_v45 = vld [vmem:[%s4041_s10 + $0x264] ss:$8 sps:$4 sm:$0xff]  }
  0xa7   : > { %1156 = vmatpush1.bf16.msra.mxu0 %v3441_v61  ;;  %v674_v61 = vpack.c.bf16 %v600_v52, %v600_v52  ;;  %v675_v0 = vpack.c.bf16 %v601_v58, %v601_v58  ;;  %v3478_v33 = vld [vmem:[%s4041_s10 + $0x334] ss:$8 sps:$4 sm:$0xff]   ;;  %v3482_v40 = vld [vmem:[%s4041_s10 + $0x340] ss:$8 sps:$4 sm:$0xff]   ;;  %v437_v52 = vmul.f32 %v436_v46, %v4231_v16  ;;  %v480_v58 = vstv %s4402_s29  ;;  %s4460_s28 = sld [smem:[#allocation4 + %s498_s20]]  ;;  %s547_s25 = sadd.s32 56, %s4079_s30 }
  0xa8   : > { %1368 = vmatpush1.bf16.msra.mxu1 %v3442_v62  ;;  %1157 = vmatprep.subr.bf16.mxu0 %v3443_v2  ;;  %v385_v55 = vadd.f32 %v384_v6, %v380_v48  ;;  %v419_v56 = vadd.f32 %v418_v41, %v414_v32  ;;  %v608_v59 = vrot.slane %v351_v53, %v4221_v10  ;;  %v3484_v6 = vld [vmem:[%s4041_s10 + $0x344] ss:$8 sps:$4 sm:$0xff]   ;;  %v3490_v29 = vld [vmem:[%s4041_s10 + $0x354] ss:$8 sps:$4 sm:$0xff]   ;;  %v3485_v41 = vld [vmem:[%s4041_s10 + $0x250] ss:$8 sps:$4 sm:$0xff]   ;;  %v471_v48 = vstv %s4390_s16 }
  0xa9   : > { %1369 = vmatprep.subr.bf16.mxu1 %v3445_v11  ;;  %1161 = vmatprep.mubr.bf16.mxu0 %v675_v0  ;;  %v3458_v11 = vld [vmem:[%s4041_s10 + $0x300] ss:$8 sps:$4 sm:$0xff]   ;;  %v3499_v53 = vld [vmem:[%s4041_s10 + $0x274] ss:$8 sps:$4 sm:$0xff]   ;;  %s4467_s2 = sld [smem:[#allocation4 + %s464_s24]]  ;;  %s551_s27 = sadd.s32 57, %s4079_s30 }
  0xaa   : > { %v390_v62 = vadd.f32 %v389_v49, %v385_v55  ;;  %v424_v63 = vadd.f32 %v423_v50, %v419_v56  ;;  %v609_v1 = vcombine.high %v608_v59, %v608_v59  ;;  %v676_v2 = vpack.c.bf16 %v608_v59, %v608_v59  ;;  %v3491_v32 = vld [vmem:[%s4041_s10 + $0x260] ss:$8 sps:$4 sm:$0xff]   ;;  %v3497_v59 = vld [vmem:[%s4041_s10 + $0x270] ss:$8 sps:$4 sm:$0xff]   ;;  %s4473_s5 = sld [smem:[#allocation4 + %s503_s1]]  ;;  %s517_s23 = sadd.s32 50, %s4079_s30 }
  0xab   : > { %1158 = vmatpush1.bf16.msra.mxu0 %v3447_v26  ;;  %v3472_v26 = vld [vmem:[%s4041_s10 + $0x324] ss:$8 sps:$4 sm:$0xff]   ;;  %v475_v49 = vstv %s4392_s17  ;;  %v433_v50 = vmul.f32 %v432_v42, %v4218_v9  ;;  %v472_v55 = vmul.f32 %v471_v48, %v4218_v9  ;;  %s4541_s16 = sld [smem:[#allocation4 + %s508_s14]]  ;;  %s556_s29 = sadd.s32 58, %s4079_s30 }
  0xac   : > { %1370 = vmatpush1.bf16.msra.mxu1 %v3448_v27  ;;  %1159 = vmatprep.subr.bf16.mxu0 %v3449_v35  ;;  %v4358_v5 = vrot.slane %v390_v62, %v4221_v10  ;;  %v429_v7 = vadd.f32 %v428_v57, %v424_v63  ;;  %v677_v8 = vpack.c.bf16 %v609_v1, %v609_v1  ;;  %v3473_v35 = vld [vmem:[%s4041_s10 + $0x230] ss:$8 sps:$4 sm:$0xff]   ;;  %v3502_v57 = vld [vmem:[%s4041_s10 + $0x374] ss:$8 sps:$4 sm:$0xff]   ;;  %v3505_v9 = vld [vmem:[%s4041_s10 + $0x284] ss:$8 sps:$4 sm:$0xff]   ;;  %v446_v63 = vstv %s4409_s8 }
  0xad   : > { %1371 = vmatprep.subr.bf16.mxu1 %v3451_v39  ;;  %v3487_v39 = vld [vmem:[%s4041_s10 + $0x254] ss:$8 sps:$4 sm:$0xff]   ;;  %v476_v56 = vmul.f32 %v475_v49, %v4231_v16  ;;  %v3500_v16 = vld [vmem:[%s4041_s10 + $0x370] ss:$8 sps:$4 sm:$0xff]   ;;  %v481_v1 = vmul.f32 %v480_v58, %v4233_v17  ;;  %v500_v42 = vstv %s4460_s28  ;;  %s4543_s17 = sld [smem:[#allocation4 + %s512_s22]]  ;;  %s522_s8 = sadd.s32 51, %s4079_s30 }
  0xae   : > { %v617_v13 = vcombine.high %v4358_v5, %v4358_v5  ;;  %v4365_v14 = vrot.slane %v429_v7, %v4221_v10  ;;  %1373 = vmatprep.mubr.bf16.mxu1 %v677_v8  ;;  %v447_v8 = vmul.f32 %v446_v63, %v4235_v18  ;;  %v3524_v49 = vld [vmem:[%s4041_s10 + $0x3b0] ss:$8 sps:$4 sm:$0xff]   ;;  %v3538_v58 = vld [vmem:[%s4041_s10 + $0x3d4] ss:$8 sps:$4 sm:$0xff]   ;;  %s4550_s19 = sld [smem:[#allocation4 + %s551_s27]]  ;;  %s576_s28 = sadd.s32 62, %s4079_s30 }
  0xaf   : > { %1160 = vmatpush1.bf16.msra.mxu0 %v3453_v47  ;;  %v3488_v47 = vld [vmem:[%s4041_s10 + $0x350] ss:$8 sps:$4 sm:$0xff]   ;;  %v477_v0 = vadd.f32 %v476_v56, %v472_v55  ;;  %v466_v48 = vstv %s4467_s2  ;;  %v3535_v55 = vld [vmem:[%s4041_s10 + $0x2d4] ss:$8 sps:$4 sm:$0xff]   ;;  %v3530_v56 = vld [vmem:[%s4041_s10 + $0x3c0] ss:$8 sps:$4 sm:$0xff]  }
  0xb0   : > { %1372 = vmatpush1.bf16.msra.mxu1 %v3454_v43  ;;  %1553 = vmatprep.subr.bf16.mxu0 %v3457_v54  ;;  %v679_v20 = vpack.c.bf16 %v617_v13, %v617_v13  ;;  %v625_v21 = vcombine.high %v4365_v14, %v4365_v14  ;;  %v3496_v43 = vld [vmem:[%s4041_s10 + $0x364] ss:$8 sps:$4 sm:$0xff]   ;;  %v441_v54 = vstv %s4397_s21  ;;  %s4548_s21 = sld [smem:[#allocation4 + %s547_s25]]  ;;  %s542_s2 = sadd.s32 55, %s4079_s30 }
  0xb1   : > { %1765 = vmatprep.subr.bf16.mxu1 %v3460_v44  ;;  %v3494_v44 = vld [vmem:[%s4041_s10 + $0x360] ss:$8 sps:$4 sm:$0xff]   ;;  %v442_v62 = vmul.f32 %v441_v54, %v4233_v17  ;;  %v482_v13 = vadd.f32 %v481_v1, %v477_v0  ;;  %v3547_v1 = vld [vmem:[%s4041_s10 + $0x2f4] ss:$8 sps:$4 sm:$0xff]   ;;  %s4555_s13 = sld [smem:[#allocation4 + %s517_s23]]  ;;  %s581_s14 = sadd.s32 63, %s4079_s30 }
  0xb2   : > { %1162 = vmatmul.mubr.bf16.vlgmr.msra.gmra.mrb[0].mxu0 %v674_v61  ;;  %v681_v27 = vpack.c.bf16 %v625_v21, %v625_v21  ;;  %v438_v61 = vadd.f32 %v437_v52, %v433_v50  ;;  %v3506_v17 = vld [vmem:[%s4041_s10 + $0x380] ss:$8 sps:$4 sm:$0xff]   ;;  %v3509_v21 = vld [vmem:[%s4041_s10 + $0x290] ss:$8 sps:$4 sm:$0xff]   ;;  %v3532_v50 = vld [vmem:[%s4041_s10 + $0x3c4] ss:$8 sps:$4 sm:$0xff]   ;;  %v505_v52 = vstv %s4473_s5 }
  0xb3   : > { %1554 = vmatpush1.bf16.msra.mxu0 %v3455_v3  ;;  %1374 = vmatmul.mubr.bf16.vlgmr.msra.gmra.mrb[0].mxu1 %v676_v2  ;;  %v3508_v3 = vld [vmem:[%s4041_s10 + $0x384] ss:$8 sps:$4 sm:$0xff]   ;;  %v485_v2 = vstv %s4416_s11  ;;  %s4561_s15 = sld [smem:[#allocation4 + %s556_s29]]  ;;  %s561_s11 = sadd.s32 59, %s4079_s30 }
  0xb4   : > { %1555 = vmatprep.subr.bf16.mxu0 %v3463_v4  ;;  %1766 = vmatpush1.bf16.msra.mxu1 %v3458_v11  ;;  %v3503_v4 = vld [vmem:[%s4041_s10 + $0x280] ss:$8 sps:$4 sm:$0xff]   ;;  %v443_v7 = vadd.f32 %v442_v62, %v438_v61  ;;  %v3511_v11 = vld [vmem:[%s4041_s10 + $0x294] ss:$8 sps:$4 sm:$0xff]   ;;  %v3541_v62 = vld [vmem:[%s4041_s10 + $0x2e4] ss:$8 sps:$4 sm:$0xff]  }
  0xb5   : > { %1767 = vmatprep.subr.bf16.mxu1 %v3466_v12  ;;  %1585 = vmatprep.mubr.bf16.mxu0 %v679_v20  ;;  %v451_v12 = vstv %s4424_s7  ;;  %v490_v20 = vstv %s4432_s26  ;;  %s4567_s4 = sld [smem:[#allocation4 + %s522_s8]]  ;;  %s527_s7 = sadd.s32 52, %s4079_s30 }
  0xb6   : > { %1797 = vmatprep.mubr.bf16.mxu1 %v681_v27  ;;  %v3517_v27 = vld [vmem:[%s4041_s10 + $0x2a4] ss:$8 sps:$4 sm:$0xff]   ;;  %s4574_s18 = sld [smem:[#allocation4 + %s561_s11]]  ;;  %s566_s26 = sadd.s32 60, %s4079_s30 }
  0xb7   : > { %1556 = vmatpush1.bf16.msra.mxu0 %v3461_v15  ;;  %v486_v15 = vmul.f32 %v485_v2, %v4235_v18  ;;  %v3512_v18 = vld [vmem:[%s4041_s10 + $0x390] ss:$8 sps:$4 sm:$0xff]   ;;  %s4586_s0 = sld [smem:[#allocation4 + %s527_s7]] }
  0xb8   : > { %1557 = vmatprep.subr.bf16.mxu0 %v3469_v19  ;;  %1768 = vmatpush1.bf16.msra.mxu1 %v3464_v22  ;;  %v3514_v19 = vld [vmem:[%s4041_s10 + $0x394] ss:$8 sps:$4 sm:$0xff]   ;;  %v448_v22 = vadd.f32 %v447_v8, %v443_v7  ;;  %v3545_v7 = vld [vmem:[%s4041_s10 + $0x2f0] ss:$8 sps:$4 sm:$0xff]   ;;  %s4594_s6 = sld [smem:[#allocation4 + %s566_s26]] }
  0xb9   : > { %1769 = vmatprep.subr.bf16.mxu1 %v3472_v26  ;;  %v452_v26 = vmul.f32 %v451_v12, %v4243_v23  ;;  %v3548_v12 = vld [vmem:[%s4041_s10 + $0x3f0] ss:$8 sps:$4 sm:$0xff]   ;;  %s4626_s5 = sld [smem:[#allocation4 + %s576_s28]] }
  0xba   : > { %s4635_s22 = sld [smem:[#allocation4 + %s542_s2]] }
  0xbb   : > { %1558 = vmatpush1.bf16.msra.mxu0 %v3467_v28  ;;  %v456_v28 = vstv %s4439_s3  ;;  %s532_s3 = sadd.s32 53, %s4079_s30  ;;  %s4641_s25 = sld [smem:[#allocation4 + %s581_s14]] }
  0xbc   : > { %1559 = vmatprep.subr.bf16.mxu0 %v3475_v31  ;;  %1770 = vmatpush1.bf16.msra.mxu1 %v3470_v34  ;;  %v487_v31 = vadd.f32 %v486_v15, %v482_v13  ;;  %v491_v34 = vmul.f32 %v490_v20, %v4243_v23  ;;  %v3518_v23 = vld [vmem:[%s4041_s10 + $0x3a0] ss:$8 sps:$4 sm:$0xff]   ;;  %v678_v13 = vpack.c.bf16 %v4358_v5, %v4358_v5  ;;  %v3556_v15 = vld [vmem:[%s4041_s10 + $0x504] ss:$8 sps:$4 sm:$0xff]   ;;  %v3562_v5 = vld [vmem:[%s4041_s10 + $0x514] ss:$8 sps:$4 sm:$0xff]  }
  0xbd   : > { %1771 = vmatprep.subr.bf16.mxu1 %v3478_v33  ;;  %v3520_v33 = vld [vmem:[%s4041_s10 + $0x3a4] ss:$8 sps:$4 sm:$0xff]   ;;  %s4603_s20 = sld [smem:[#allocation4 + %s532_s3]] }
  0xbf   : > { %1560 = vmatpush1.bf16.msra.mxu0 %v3473_v35  ;;  %v495_v35 = vstv %s4446_s9  ;;  %s571_s9 = sadd.s32 61, %s4079_s30 }
  0xc0   : > { %1561 = vmatprep.subr.bf16.mxu0 %v3481_v36  ;;  %1772 = vmatpush1.bf16.msra.mxu1 %v3476_v37  ;;  %v3515_v36 = vld [vmem:[%s4041_s10 + $0x2a0] ss:$8 sps:$4 sm:$0xff]   ;;  %v453_v37 = vadd.f32 %v452_v26, %v448_v22  ;;  %v3559_v22 = vld [vmem:[%s4041_s10 + $0x414] ss:$8 sps:$4 sm:$0xff]   ;;  %s4610_s24 = sld [smem:[#allocation4 + %s571_s9]] }
  0xc1   : > { %1773 = vmatprep.subr.bf16.mxu1 %v3484_v6  ;;  %v457_v6 = vmul.f32 %v456_v28, %v4245_v24  ;;  %v3554_v26 = vld [vmem:[%s4041_s10 + $0x500] ss:$8 sps:$4 sm:$0xff]   ;;  %v3557_v28 = vld [vmem:[%s4041_s10 + $0x410] ss:$8 sps:$4 sm:$0xff]  }
  0xc3   : > { %1562 = vmatpush1.bf16.msra.mxu0 %v3479_v38  ;;  %v3523_v38 = vld [vmem:[%s4041_s10 + $0x2b4] ss:$8 sps:$4 sm:$0xff]   ;;  %v458_v46 = vadd.f32 %v457_v6, %v453_v37  ;;  %v3569_v37 = vld [vmem:[%s4041_s10 + $0x430] ss:$8 sps:$4 sm:$0xff]   ;;  %v3577_v6 = vld [vmem:[%s4041_s10 + $0x444] ss:$8 sps:$4 sm:$0xff]  }
  0xc4   : > { %1563 = vmatprep.subr.bf16.mxu0 %v3487_v39  ;;  %1774 = vmatpush1.bf16.msra.mxu1 %v3482_v40  ;;  %v461_v39 = vstv %s4453_s12  ;;  %v492_v40 = vadd.f32 %v491_v34, %v487_v31  ;;  %v3568_v31 = vld [vmem:[%s4041_s10 + $0x524] ss:$8 sps:$4 sm:$0xff]   ;;  %v3563_v34 = vld [vmem:[%s4041_s10 + $0x420] ss:$8 sps:$4 sm:$0xff]   ;;  %s537_s12 = sadd.s32 54, %s4079_s30  ;;  %s4935_s30 = sld [smem:[#allocation14_spill]] }
  0xc5   : > { %1775 = vmatprep.subr.bf16.mxu1 %v3490_v29  ;;  %v496_v29 = vmul.f32 %v495_v35, %v4245_v24  ;;  %v501_v24 = vmul.f32 %v500_v42, %v4247_v25  ;;  %v3566_v35 = vld [vmem:[%s4041_s10 + $0x520] ss:$8 sps:$4 sm:$0xff]   ;;  %v3586_v42 = vld [vmem:[%s4041_s10 + $0x554] ss:$8 sps:$4 sm:$0xff]   ;;  %s4619_s1 = sld [smem:[#allocation4 + %s537_s12]] }
  0xc7   : > { %1564 = vmatpush1.bf16.msra.mxu0 %v3485_v41  ;;  %v3526_v41 = vld [vmem:[%s4041_s10 + $0x3b4] ss:$8 sps:$4 sm:$0xff]  }
  0xc8   : > { %1565 = vmatprep.subr.bf16.mxu0 %v3493_v45  ;;  %1776 = vmatpush1.bf16.msra.mxu1 %v3488_v47  ;;  %v3521_v45 = vld [vmem:[%s4041_s10 + $0x2b0] ss:$8 sps:$4 sm:$0xff]   ;;  %v462_v47 = vmul.f32 %v461_v39, %v4247_v25  ;;  %v506_v25 = vmul.f32 %v505_v52, %v4257_v30  ;;  %v3580_v39 = vld [vmem:[%s4041_s10 + $0x544] ss:$8 sps:$4 sm:$0xff]  }
  0xc9   : > { %1777 = vmatprep.subr.bf16.mxu1 %v3496_v43  ;;  %v3529_v43 = vld [vmem:[%s4041_s10 + $0x2c4] ss:$8 sps:$4 sm:$0xff]  }
  0xca   : > { %v463_v54 = vadd.f32 %v462_v47, %v458_v46  ;;  %v510_v46 = vstv %s4541_s16  ;;  %v514_v47 = vstv %s4543_s17  ;;  %p946_p9 = scmp.gt.s32.totalorder %s4935_s30, 0  ;;  %p3282_p7 = scmp.ne.s32.totalorder %s4935_s30, 2 }
  0xcb   : > { %1566 = vmatpush1.bf16.msra.mxu0 %v3491_v32  ;;  %v497_v32 = vadd.f32 %v496_v29, %v492_v40  ;;  %v3583_v40 = vld [vmem:[%s4041_s10 + $0x454] ss:$8 sps:$4 sm:$0xff]   ;;  %v3578_v29 = vld [vmem:[%s4041_s10 + $0x540] ss:$8 sps:$4 sm:$0xff]   ;;  %vm2762_vm0 = vcmask (!%p3282_p7), 1041408   ;;  %s4936_s23 = sld [smem:[#allocation21_spill]] (!%p3282_p7) }
  0xcc   : > { %1567 = vmatprep.subr.bf16.mxu0 %v3499_v53  ;;  %1778 = vmatpush1.bf16.msra.mxu1 %v3494_v44  ;;  %v3527_v53 = vld [vmem:[%s4041_s10 + $0x2c0] ss:$8 sps:$4 sm:$0xff]   ;;  %v467_v44 = vmul.f32 %v466_v48, %v4257_v30  ;;  %v3592_v48 = vld [vmem:[%s4041_s10 + $0x564] ss:$8 sps:$4 sm:$0xff]   ;;  %s947_s27 = scalar_select %p946_p9, 1, 0 }
  0xcd   : > { %1779 = vmatprep.subr.bf16.mxu1 %v3502_v57  ;;  %v502_v57 = vadd.f32 %v501_v24, %v497_v32  ;;  %v3539_v30 = vld [vmem:[%s4041_s10 + $0x2e0] ss:$8 sps:$4 sm:$0xff]   ;;  %v553_v32 = vstv %s4550_s19  ;;  %vm3869_vm1 = vmmov (!%p3282_p7), 0   ;;  %s4937_s12 = sld [smem:[#allocation20_spill]] (!%p3282_p7)  ;;  %vm2860_vm2 = vcmask (!%p3282_p7), 1041409  }
  0xce   : > { %v468_v61 = vadd.f32 %v467_v44, %v463_v54  ;;  %v3587_v24 = vld [vmem:[%s4041_s10 + $0x460] ss:$8 sps:$4 sm:$0xff]   ;;  %v3595_v44 = vld [vmem:[%s4041_s10 + $0x474] ss:$8 sps:$4 sm:$0xff]   ;;  %s948_s16 = scvt.s32.f32 %s947_s27  ;;  %vm2862_vm3 = vcmask (!%p3282_p7), 1042434   ;;  %vm2864_vm4 = vcmask (!%p3282_p7), 1043459  }
  0xcf   : > { %1568 = vmatpush1.bf16.msra.mxu0 %v3497_v59  ;;  %v3533_v59 = vld [vmem:[%s4041_s10 + $0x2d0] ss:$8 sps:$4 sm:$0xff]   ;;  %v507_v63 = vadd.f32 %v506_v25, %v502_v57  ;;  %vm2866_vm5 = vcmask (!%p3282_p7), 1044484   ;;  %vm2868_vm6 = vcmask (!%p3282_p7), 1045509   ;;  %vm2870_vm7 = vcmask (!%p3282_p7), 1046534  }
  0xd0   : > { %1569 = vmatprep.subr.bf16.mxu0 %v3505_v9  ;;  %1780 = vmatpush1.bf16.msra.mxu1 %v3500_v16  ;;  %v3536_v9 = vld [vmem:[%s4041_s10 + $0x3d0] ss:$8 sps:$4 sm:$0xff]   ;;  %v3544_v16 = vld [vmem:[%s4041_s10 + $0x3e4] ss:$8 sps:$4 sm:$0xff]   ;;  %v4503_v0 = vrot.slane %v468_v61, %v4221_v10  ;;  %vm2872_vm8 = vcmask (!%p3282_p7), 1047559   ;;  %vm2875_vm9 = vcmask (!%p3282_p7), 64512  }
  0xd1   : > { %1781 = vmatprep.subr.bf16.mxu1 %v3508_v3  ;;  %v3542_v3 = vld [vmem:[%s4041_s10 + $0x3e0] ss:$8 sps:$4 sm:$0xff]   ;;  %v4508_v2 = vrot.slane %v507_v63, %v4221_v10  ;;  %v3593_v61 = vld [vmem:[%s4041_s10 + $0x470] ss:$8 sps:$4 sm:$0xff]   ;;  %vm2949_vm10 = vcmask (!%p3282_p7), 10240  }
  0xd2   : > { %v633_v8 = vcombine.high %v4503_v0, %v4503_v0 }
  0xd3   : > { %1570 = vmatpush1.bf16.msra.mxu0 %v3503_v4  ;;  %v3550_v4 = vld [vmem:[%s4041_s10 + $0x3f4] ss:$8 sps:$4 sm:$0xff]  }
  0xd4   : > { %1571 = vmatprep.subr.bf16.mxu0 %v3511_v11  ;;  %1782 = vmatpush1.bf16.msra.mxu1 %v3506_v17  ;;  %v3553_v11 = vld [vmem:[%s4041_s10 + $0x404] ss:$8 sps:$4 sm:$0xff]   ;;  %v641_v17 = vcombine.high %v4508_v2, %v4508_v2  ;;  %v683_v20 = vpack.c.bf16 %v633_v8, %v633_v8  ;;  %v563_v8 = vstv %s4574_s18 }
  0xd5   : > { %1783 = vmatprep.subr.bf16.mxu1 %v3514_v19  ;;  %v3551_v19 = vld [vmem:[%s4041_s10 + $0x400] ss:$8 sps:$4 sm:$0xff]  }
  0xd7   : > { %1572 = vmatpush1.bf16.msra.mxu0 %v3509_v21  ;;  %v680_v21 = vpack.c.bf16 %v4365_v14, %v4365_v14  ;;  %v3565_v14 = vld [vmem:[%s4041_s10 + $0x424] ss:$8 sps:$4 sm:$0xff]  }
  0xd8   : > { %1573 = vmatprep.subr.bf16.mxu0 %v3517_v27  ;;  %1784 = vmatpush1.bf16.msra.mxu1 %v3512_v18  ;;  %v685_v27 = vpack.c.bf16 %v641_v17, %v641_v17  ;;  %v3560_v18 = vld [vmem:[%s4041_s10 + $0x510] ss:$8 sps:$4 sm:$0xff]   ;;  %v4613_v17 = vld [vmem:[#allocation2 + $0xc] sm:$0xf] }
  0xd9   : > { %1785 = vmatprep.subr.bf16.mxu1 %v3520_v33  ;;  %v3571_v33 = vld [vmem:[%s4041_s10 + $0x434] ss:$8 sps:$4 sm:$0xff]  }
  0xdb   : > { %1574 = vmatpush1.bf16.msra.mxu0 %v3515_v36  ;;  %v3574_v36 = vld [vmem:[%s4041_s10 + $0x534] ss:$8 sps:$4 sm:$0xff]  }
  0xdc   : > { %1575 = vmatprep.subr.bf16.mxu0 %v3523_v38  ;;  %1786 = vmatpush1.bf16.msra.mxu1 %v3518_v23  ;;  %v3572_v38 = vld [vmem:[%s4041_s10 + $0x530] ss:$8 sps:$4 sm:$0xff]   ;;  %v3575_v23 = vld [vmem:[%s4041_s10 + $0x440] ss:$8 sps:$4 sm:$0xff]  }
  0xdd   : > { %1787 = vmatprep.subr.bf16.mxu1 %v3526_v41  ;;  %v3581_v41 = vld [vmem:[%s4041_s10 + $0x450] ss:$8 sps:$4 sm:$0xff]  }
  0xdf   : > { %1576 = vmatpush1.bf16.msra.mxu0 %v3521_v45  ;;  %v3589_v45 = vld [vmem:[%s4041_s10 + $0x464] ss:$8 sps:$4 sm:$0xff]  }
  0xe0   : > { %1577 = vmatprep.subr.bf16.mxu0 %v3529_v43  ;;  %1788 = vmatpush1.bf16.msra.mxu1 %v3524_v49  ;;  %v3584_v43 = vld [vmem:[%s4041_s10 + $0x550] ss:$8 sps:$4 sm:$0xff]   ;;  %v549_v49 = vstv %s4548_s21 }
  0xe1   : > { %1789 = vmatprep.subr.bf16.mxu1 %v3532_v50  ;;  %v4577_v50 = vld [vmem:[#allocation2] sm:$0xf] }
  0xe2   : > { %v511_v52 = vmul.f32 %v4577_v50, %v510_v46  ;;  %v550_v57 = vmul.f32 %v4577_v50, %v549_v49 }
  0xe3   : > { %1578 = vmatpush1.bf16.msra.mxu0 %v3527_v53  ;;  %v4580_v53 = vld [vmem:[#allocation2 + $0x4] sm:$0xf] }
  0xe4   : > { %1579 = vmatprep.subr.bf16.mxu0 %v3535_v55  ;;  %1790 = vmatpush1.bf16.msra.mxu1 %v3530_v56  ;;  %v515_v54 = vmul.f32 %v4580_v53, %v514_v47  ;;  %v519_v55 = vstv %s4555_s13  ;;  %v3590_v56 = vld [vmem:[%s4041_s10 + $0x560] ss:$8 sps:$4 sm:$0xff]   ;;  %v554_v25 = vmul.f32 %v4580_v53, %v553_v32  ;;  %v3622_v47 = vld [vmem:[%s4041_s10 + $0x5b4] ss:$8 sps:$4 sm:$0xff]   ;;  %v4654_v32 = vld [vmem:[#allocation2 + $0x18] sm:$0xf] }
  0xe5   : > { %1791 = vmatprep.subr.bf16.mxu1 %v3538_v58  ;;  %v3598_v58 = vld [vmem:[%s4041_s10 + $0x574] ss:$8 sps:$4 sm:$0xff]  }
  0xe7   : > { %1580 = vmatpush1.bf16.msra.mxu0 %v3533_v59  ;;  %v558_v59 = vstv %s4561_s15 }
  0xe8   : > { %1581 = vmatprep.subr.bf16.mxu0 %v3541_v62  ;;  %1792 = vmatpush1.bf16.msra.mxu1 %v3536_v9  ;;  %v516_v62 = vadd.f32 %v515_v54, %v511_v52  ;;  %v4597_v9 = vld [vmem:[#allocation2 + $0x8] sm:$0xf]  ;;  %v3625_v52 = vld [vmem:[%s4041_s10 + $0x4c4] ss:$8 sps:$4 sm:$0xff]   ;;  %v544_v54 = vstv %s4635_s22 }
  0xe9   : > { %1793 = vmatprep.subr.bf16.mxu1 %v3544_v16  ;;  %v520_v63 = vmul.f32 %v4597_v9, %v519_v55  ;;  %v3601_v16 = vld [vmem:[%s4041_s10 + $0x484] ss:$8 sps:$4 sm:$0xff]  }
  0xeb   : > { %1582 = vmatpush1.bf16.msra.mxu0 %v3539_v30  ;;  %v524_v30 = vstv %s4567_s4 }
  0xec   : > { %1583 = vmatprep.subr.bf16.mxu0 %v3547_v1  ;;  %1794 = vmatpush1.bf16.msra.mxu1 %v3542_v3  ;;  %v3596_v1 = vld [vmem:[%s4041_s10 + $0x570] ss:$8 sps:$4 sm:$0xff]   ;;  %v555_v3 = vadd.f32 %v554_v25, %v550_v57  ;;  %v3628_v57 = vld [vmem:[%s4041_s10 + $0x5c4] ss:$8 sps:$4 sm:$0xff]   ;;  %v583_v25 = vstv %s4641_s25 }
  0xed   : > { %1795 = vmatprep.subr.bf16.mxu1 %v3550_v4  ;;  %v559_v4 = vmul.f32 %v4597_v9, %v558_v59 }
  0xef   : > { %1584 = vmatpush1.bf16.msra.mxu0 %v3545_v7  ;;  %v3604_v7 = vld [vmem:[%s4041_s10 + $0x584] ss:$8 sps:$4 sm:$0xff]  }
  0xf0   : > { %1977 = vmatprep.subr.bf16.mxu0 %v3553_v11  ;;  %1796 = vmatpush1.bf16.msra.mxu1 %v3548_v12  ;;  %v3599_v11 = vld [vmem:[%s4041_s10 + $0x480] ss:$8 sps:$4 sm:$0xff]   ;;  %v521_v12 = vadd.f32 %v520_v63, %v516_v62  ;;  %v3631_v63 = vld [vmem:[%s4041_s10 + $0x4d4] ss:$8 sps:$4 sm:$0xff]  }
  0xf1   : > { %2189 = vmatprep.subr.bf16.mxu1 %v3556_v15  ;;  %v3607_v15 = vld [vmem:[%s4041_s10 + $0x494] ss:$8 sps:$4 sm:$0xff]  }
  0xf2   : > { %1586 = vmatmul.mubr.bf16.vlgmr.msra.gmra.mrb[4].mxu0 %v678_v13  ;;  %v525_v13 = vmul.f32 %v4613_v17, %v524_v30 }
  0xf3   : > { %1978 = vmatpush1.bf16.msra.mxu0 %v3551_v19  ;;  %2009 = vmatprep.mubr.bf16.mxu0 %v683_v20  ;;  %v529_v19 = vstv %s4586_s0  ;;  %v3602_v20 = vld [vmem:[%s4041_s10 + $0x580] ss:$8 sps:$4 sm:$0xff]  }
  0xf4   : > { %1798 = vmatmul.mubr.bf16.vlgmr.msra.gmra.mrb[4].mxu1 %v680_v21  ;;  %1979 = vmatprep.subr.bf16.mxu0 %v3559_v22  ;;  %v560_v21 = vadd.f32 %v559_v4, %v555_v3  ;;  %v564_v22 = vmul.f32 %v4613_v17, %v563_v8  ;;  %v3634_v3 = vld [vmem:[%s4041_s10 + $0x5d4] ss:$8 sps:$4 sm:$0xff]   ;;  %v3629_v4 = vld [vmem:[%s4041_s10 + $0x4d0] ss:$8 sps:$4 sm:$0xff]   ;;  %v3637_v8 = vld [vmem:[%s4041_s10 + $0x4e4] ss:$8 sps:$4 sm:$0xff]  }
  0xf5   : > { %2190 = vmatpush1.bf16.msra.mxu1 %v3554_v26  ;;  %2221 = vmatprep.mubr.bf16.mxu1 %v685_v27  ;;  %v3610_v26 = vld [vmem:[%s4041_s10 + $0x594] ss:$8 sps:$4 sm:$0xff]   ;;  %v568_v27 = vstv %s4594_s6 }
  0xf6   : > { %2191 = vmatprep.subr.bf16.mxu1 %v3562_v5  ;;  %v3605_v5 = vld [vmem:[%s4041_s10 + $0x490] ss:$8 sps:$4 sm:$0xff]  }
  0xf7   : > { %1980 = vmatpush1.bf16.msra.mxu0 %v3557_v28  ;;  %v526_v28 = vadd.f32 %v525_v13, %v521_v12  ;;  %v3640_v13 = vld [vmem:[%s4041_s10 + $0x5e4] ss:$8 sps:$4 sm:$0xff]  }
  0xf8   : > { %1981 = vmatprep.subr.bf16.mxu0 %v3565_v14  ;;  %v4629_v14 = vld [vmem:[#allocation2 + $0x10] sm:$0xf] }
  0xf9   : > { %2192 = vmatpush1.bf16.msra.mxu1 %v3560_v18  ;;  %v530_v18 = vmul.f32 %v4629_v14, %v529_v19 }
  0xfa   : > { %2193 = vmatprep.subr.bf16.mxu1 %v3568_v31  ;;  %v3613_v31 = vld [vmem:[%s4041_s10 + $0x4a4] ss:$8 sps:$4 sm:$0xff]  }
  0xfb   : > { %1982 = vmatpush1.bf16.msra.mxu0 %v3563_v34  ;;  %v534_v34 = vstv %s4603_s20 }
  0xfc   : > { %1983 = vmatprep.subr.bf16.mxu0 %v3571_v33  ;;  %v3608_v33 = vld [vmem:[%s4041_s10 + $0x590] ss:$8 sps:$4 sm:$0xff]  }
  0xfd   : > { %2194 = vmatpush1.bf16.msra.mxu1 %v3566_v35  ;;  %v565_v35 = vadd.f32 %v564_v22, %v560_v21  ;;  %v3638_v21 = vld [vmem:[%s4041_s10 + $0x5e0] ss:$8 sps:$4 sm:$0xff]  }
  0xfe   : > { %2195 = vmatprep.subr.bf16.mxu1 %v3574_v36  ;;  %v569_v36 = vmul.f32 %v4629_v14, %v568_v27  ;;  %v3641_v27 = vld [vmem:[%s4041_s10 + $0x4f0] ss:$8 sps:$4 sm:$0xff]  }
  0xff   : > { %1984 = vmatpush1.bf16.msra.mxu0 %v3569_v37  ;;  %v3616_v37 = vld [vmem:[%s4041_s10 + $0x5a4] ss:$8 sps:$4 sm:$0xff]  }
 0x100   : > { %1985 = vmatprep.subr.bf16.mxu0 %v3577_v6  ;;  %v573_v6 = vstv %s4610_s24 }
 0x101   : > { %2196 = vmatpush1.bf16.msra.mxu1 %v3572_v38  ;;  %v3611_v38 = vld [vmem:[%s4041_s10 + $0x4a0] ss:$8 sps:$4 sm:$0xff]  }
 0x102   : > { %2197 = vmatprep.subr.bf16.mxu1 %v3580_v39  ;;  %v531_v39 = vadd.f32 %v530_v18, %v526_v28  ;;  %v3649_v28 = vld [vmem:[%s4041_s10 + $0x604] ss:$8 sps:$4 sm:$0xff]   ;;  %v3644_v18 = vld [vmem:[%s4041_s10 + $0x5f0] ss:$8 sps:$4 sm:$0xff]  }
 0x103   : > { %1986 = vmatpush1.bf16.msra.mxu0 %v3575_v23  ;;  %v4644_v23 = vld [vmem:[#allocation2 + $0x14] sm:$0xf] }
 0x104   : > { %1987 = vmatprep.subr.bf16.mxu0 %v3583_v40  ;;  %v535_v40 = vmul.f32 %v4644_v23, %v534_v34  ;;  %v574_v46 = vmul.f32 %v4644_v23, %v573_v6  ;;  %v682_v34 = vpack.c.bf16 %v4503_v0, %v4503_v0  ;;  %v3655_v6 = vld [vmem:[%s4041_s10 + $0x614] ss:$8 sps:$4 sm:$0xff]  }
 0x105   : > { %2198 = vmatpush1.bf16.msra.mxu1 %v3578_v29  ;;  %v3619_v29 = vld [vmem:[%s4041_s10 + $0x4b4] ss:$8 sps:$4 sm:$0xff]  }
 0x106   : > { %2199 = vmatprep.subr.bf16.mxu1 %v3586_v42  ;;  %v3614_v42 = vld [vmem:[%s4041_s10 + $0x5a0] ss:$8 sps:$4 sm:$0xff]   ;;  %v536_v49 = vadd.f32 %v535_v40, %v531_v39  ;;  %v3658_v0 = vld [vmem:[%s4041_s10 + $0x714] ss:$8 sps:$4 sm:$0xff]   ;;  %v3653_v40 = vld [vmem:[%s4041_s10 + $0x610] ss:$8 sps:$4 sm:$0xff]  }
 0x107   : > { %1988 = vmatpush1.bf16.msra.mxu0 %v3581_v41  ;;  %v539_v41 = vstv %s4619_s1  ;;  %s4938_s1 = sld [smem:[#allocation22_spill]] (!%p3282_p7) }
 0x108   : > { %1989 = vmatprep.subr.bf16.mxu0 %v3589_v45  ;;  %v570_v45 = vadd.f32 %v569_v36, %v565_v35  ;;  %v3647_v35 = vld [vmem:[%s4041_s10 + $0x600] ss:$8 sps:$4 sm:$0xff]  }
 0x109   : > { %2200 = vmatpush1.bf16.msra.mxu1 %v3584_v43  ;;  %v578_v43 = vstv %s4626_s5 }
 0x10a   : > { %2201 = vmatprep.subr.bf16.mxu1 %v3592_v48  ;;  %v3617_v48 = vld [vmem:[%s4041_s10 + $0x4b0] ss:$8 sps:$4 sm:$0xff]   ;;  %v575_v55 = vadd.f32 %v574_v46, %v570_v45  ;;  %v3667_v45 = vld [vmem:[%s4041_s10 + $0x634] ss:$8 sps:$4 sm:$0xff]   ;;  %v3662_v46 = vld [vmem:[%s4041_s10 + $0x720] ss:$8 sps:$4 sm:$0xff]  }
 0x10b   : > { %1990 = vmatpush1.bf16.msra.mxu0 %v3587_v24  ;;  %v540_v24 = vmul.f32 %v4654_v32, %v539_v41  ;;  %v3664_v41 = vld [vmem:[%s4041_s10 + $0x724] ss:$8 sps:$4 sm:$0xff]  }
 0x10c   : > { %1991 = vmatprep.subr.bf16.mxu0 %v3595_v44  ;;  %v3620_v44 = vld [vmem:[%s4041_s10 + $0x5b0] ss:$8 sps:$4 sm:$0xff]  }
 0x10d   : > { %2202 = vmatpush1.bf16.msra.mxu1 %v3590_v56  ;;  %v579_v56 = vmul.f32 %v4654_v32, %v578_v43  ;;  %v541_v59 = vadd.f32 %v540_v24, %v536_v49  ;;  %v3665_v43 = vld [vmem:[%s4041_s10 + $0x630] ss:$8 sps:$4 sm:$0xff]   ;;  %v3676_v24 = vld [vmem:[%s4041_s10 + $0x744] ss:$8 sps:$4 sm:$0xff]  }
 0x10e   : > { %2203 = vmatprep.subr.bf16.mxu1 %v3598_v58  ;;  %v3623_v58 = vld [vmem:[%s4041_s10 + $0x4c0] ss:$8 sps:$4 sm:$0xff]   ;;  %v3668_v49 = vld [vmem:[%s4041_s10 + $0x730] ss:$8 sps:$4 sm:$0xff]  }
 0x10f   : > { %1992 = vmatpush1.bf16.msra.mxu0 %v3593_v61  ;;  %v4664_v61 = vld [vmem:[#allocation2 + $0x1c] sm:$0xf]  ;;  %v580_v30 = vadd.f32 %v579_v56, %v575_v55  ;;  %v3677_v56 = vld [vmem:[%s4041_s10 + $0x650] ss:$8 sps:$4 sm:$0xff]  }
 0x110   : > { %1993 = vmatprep.subr.bf16.mxu0 %v3601_v16  ;;  %v545_v62 = vmul.f32 %v4664_v61, %v544_v54  ;;  %v3626_v16 = vld [vmem:[%s4041_s10 + $0x5c0] ss:$8 sps:$4 sm:$0xff]   ;;  %v3679_v54 = vld [vmem:[%s4041_s10 + $0x654] ss:$8 sps:$4 sm:$0xff]  }
 0x111   : > { %2204 = vmatpush1.bf16.msra.mxu1 %v3596_v1  ;;  %v584_v1 = vmul.f32 %v4664_v61, %v583_v25  ;;  %v3682_v55 = vld [vmem:[%s4041_s10 + $0x754] ss:$8 sps:$4 sm:$0xff]   ;;  %v3680_v25 = vld [vmem:[%s4041_s10 + $0x750] ss:$8 sps:$4 sm:$0xff]  }
 0x112   : > { %2205 = vmatprep.subr.bf16.mxu1 %v3604_v7  ;;  %v546_v7 = vadd.f32 %v545_v62, %v541_v59  ;;  %v3683_v59 = vld [vmem:[%s4041_s10 + $0x660] ss:$8 sps:$4 sm:$0xff]   ;;  %v3691_v62 = vld [vmem:[%s4041_s10 + $0x674] ss:$8 sps:$4 sm:$0xff]  }
 0x113   : > { %1994 = vmatpush1.bf16.msra.mxu0 %v3599_v11  ;;  %v3632_v11 = vld [vmem:[%s4041_s10 + $0x5d0] ss:$8 sps:$4 sm:$0xff]   ;;  %v585_v12 = vadd.f32 %v584_v1, %v580_v30  ;;  %v3697_v1 = vld [vmem:[%s4041_s10 + $0x684] ss:$8 sps:$4 sm:$0xff]  }
 0x114   : > { %1995 = vmatprep.subr.bf16.mxu0 %v3607_v15  ;;  %v3635_v15 = vld [vmem:[%s4041_s10 + $0x4e0] ss:$8 sps:$4 sm:$0xff]   ;;  %v4677_v19 = vrot.slane %v546_v7, %v4221_v10  ;;  %v3689_v30 = vld [vmem:[%s4041_s10 + $0x670] ss:$8 sps:$4 sm:$0xff]  }
 0x115   : > { %2206 = vmatpush1.bf16.msra.mxu1 %v3602_v20  ;;  %v3643_v20 = vld [vmem:[%s4041_s10 + $0x4f4] ss:$8 sps:$4 sm:$0xff]   ;;  %v4682_v22 = vrot.slane %v585_v12, %v4221_v10  ;;  %v3695_v7 = vld [vmem:[%s4041_s10 + $0x680] ss:$8 sps:$4 sm:$0xff]  }
 0x116   : > { %2207 = vmatprep.subr.bf16.mxu1 %v3610_v26  ;;  %v3646_v26 = vld [vmem:[%s4041_s10 + $0x5f4] ss:$8 sps:$4 sm:$0xff]  }
 0x117   : > { %1996 = vmatpush1.bf16.msra.mxu0 %v3605_v5  ;;  %v649_v5 = vcombine.high %v4677_v19, %v4677_v19  ;;  %v3706_v12 = vld [vmem:[%s4041_s10 + $0x794] ss:$8 sps:$4 sm:$0xff]  }
 0x118   : > { %1997 = vmatprep.subr.bf16.mxu0 %v3613_v31  ;;  %v657_v31 = vcombine.high %v4682_v22, %v4682_v22 }
 0x119   : > { %2208 = vmatpush1.bf16.msra.mxu1 %v3608_v33  ;;  %v3652_v33 = vld [vmem:[%s4041_s10 + $0x704] ss:$8 sps:$4 sm:$0xff]   ;;  %v687_v36 = vpack.c.bf16 %v649_v5, %v649_v5  ;;  %v3710_v5 = vld [vmem:[%s4041_s10 + $0x7a0] ss:$8 sps:$4 sm:$0xff]  }
 0x11a   : > { %2209 = vmatprep.subr.bf16.mxu1 %v3616_v37  ;;  %v684_v37 = vpack.c.bf16 %v4508_v2, %v4508_v2  ;;  %v689_v39 = vpack.c.bf16 %v657_v31, %v657_v31  ;;  %v3661_v2 = vld [vmem:[%s4041_s10 + $0x624] ss:$8 sps:$4 sm:$0xff]  }
 0x11b   : > { %1998 = vmatpush1.bf16.msra.mxu0 %v3611_v38  ;;  %v3650_v38 = vld [vmem:[%s4041_s10 + $0x700] ss:$8 sps:$4 sm:$0xff]   ;;  %v3721_v31 = vld [vmem:[%s4041_s10 + $0x6c4] ss:$8 sps:$4 sm:$0xff]  }
 0x11c   : > { %1999 = vmatprep.subr.bf16.mxu0 %v3619_v29  ;;  %v3656_v29 = vld [vmem:[%s4041_s10 + $0x710] ss:$8 sps:$4 sm:$0xff]  }
 0x11d   : > { %2210 = vmatpush1.bf16.msra.mxu1 %v3614_v42  ;;  %v3659_v42 = vld [vmem:[%s4041_s10 + $0x620] ss:$8 sps:$4 sm:$0xff]  }
 0x11e   : > { %2211 = vmatprep.subr.bf16.mxu1 %v3622_v47  ;;  %v3670_v47 = vld [vmem:[%s4041_s10 + $0x734] ss:$8 sps:$4 sm:$0xff]  }
 0x11f   : > { %2000 = vmatpush1.bf16.msra.mxu0 %v3617_v48  ;;  %v3673_v48 = vld [vmem:[%s4041_s10 + $0x644] ss:$8 sps:$4 sm:$0xff]  }
 0x120   : > { %2001 = vmatprep.subr.bf16.mxu0 %v3625_v52  ;;  %v3671_v52 = vld [vmem:[%s4041_s10 + $0x640] ss:$8 sps:$4 sm:$0xff]  }
 0x121   : > { %2212 = vmatpush1.bf16.msra.mxu1 %v3620_v44  ;;  %v3674_v44 = vld [vmem:[%s4041_s10 + $0x740] ss:$8 sps:$4 sm:$0xff]  }
 0x122   : > { %2213 = vmatprep.subr.bf16.mxu1 %v3628_v57  ;;  %v3685_v57 = vld [vmem:[%s4041_s10 + $0x664] ss:$8 sps:$4 sm:$0xff]  }
 0x123   : > { %2002 = vmatpush1.bf16.msra.mxu0 %v3623_v58  ;;  %v3688_v58 = vld [vmem:[%s4041_s10 + $0x764] ss:$8 sps:$4 sm:$0xff]  }
 0x124   : > { %2003 = vmatprep.subr.bf16.mxu0 %v3631_v63  ;;  %v3686_v63 = vld [vmem:[%s4041_s10 + $0x760] ss:$8 sps:$4 sm:$0xff]  }
 0x125   : > { %2214 = vmatpush1.bf16.msra.mxu1 %v3626_v16  ;;  %v3694_v16 = vld [vmem:[%s4041_s10 + $0x774] ss:$8 sps:$4 sm:$0xff]  }
 0x126   : > { %2215 = vmatprep.subr.bf16.mxu1 %v3634_v3  ;;  %v3692_v3 = vld [vmem:[%s4041_s10 + $0x770] ss:$8 sps:$4 sm:$0xff]  }
 0x127   : > { %2004 = vmatpush1.bf16.msra.mxu0 %v3629_v4  ;;  %v3700_v4 = vld [vmem:[%s4041_s10 + $0x784] ss:$8 sps:$4 sm:$0xff]  }
 0x128   : > { %2005 = vmatprep.subr.bf16.mxu0 %v3637_v8  ;;  %v3703_v8 = vld [vmem:[%s4041_s10 + $0x694] ss:$8 sps:$4 sm:$0xff]  }
 0x129   : > { %2216 = vmatpush1.bf16.msra.mxu1 %v3632_v11  ;;  %v3698_v11 = vld [vmem:[%s4041_s10 + $0x780] ss:$8 sps:$4 sm:$0xff]  }
 0x12a   : > { %2217 = vmatprep.subr.bf16.mxu1 %v3640_v13  ;;  %v3701_v13 = vld [vmem:[%s4041_s10 + $0x690] ss:$8 sps:$4 sm:$0xff]  }
 0x12b   : > { %2006 = vmatpush1.bf16.msra.mxu0 %v3635_v15  ;;  %v3709_v15 = vld [vmem:[%s4041_s10 + $0x6a4] ss:$8 sps:$4 sm:$0xff]  }
 0x12c   : > { %2007 = vmatprep.subr.bf16.mxu0 %v3643_v20  ;;  %v3704_v20 = vld [vmem:[%s4041_s10 + $0x790] ss:$8 sps:$4 sm:$0xff]  }
 0x12d   : > { %2218 = vmatpush1.bf16.msra.mxu1 %v3638_v21  ;;  %v3712_v21 = vld [vmem:[%s4041_s10 + $0x7a4] ss:$8 sps:$4 sm:$0xff]  }
 0x12e   : > { %2219 = vmatprep.subr.bf16.mxu1 %v3646_v26  ;;  %v3707_v26 = vld [vmem:[%s4041_s10 + $0x6a0] ss:$8 sps:$4 sm:$0xff]  }
 0x12f   : > { %2008 = vmatpush1.bf16.msra.mxu0 %v3641_v27  ;;  %v3715_v27 = vld [vmem:[%s4041_s10 + $0x6b4] ss:$8 sps:$4 sm:$0xff]  }
 0x130   : > { %2401 = vmatprep.subr.bf16.mxu0 %v3649_v28  ;;  %v3718_v28 = vld [vmem:[%s4041_s10 + $0x7b4] ss:$8 sps:$4 sm:$0xff]  }
 0x131   : > { %2220 = vmatpush1.bf16.msra.mxu1 %v3644_v18  ;;  %v3713_v18 = vld [vmem:[%s4041_s10 + $0x6b0] ss:$8 sps:$4 sm:$0xff]  }
 0x132   : > { %2010 = vmatmul.mubr.bf16.vlgmr.msra.gmra.mrb[8].mxu0 %v682_v34  ;;  %2613 = vmatprep.subr.bf16.mxu1 %v3652_v33  ;;  %v3716_v34 = vld [vmem:[%s4041_s10 + $0x7b0] ss:$8 sps:$4 sm:$0xff]   ;;  %v3724_v33 = vld [vmem:[%s4041_s10 + $0x7c4] ss:$8 sps:$4 sm:$0xff]  }
 0x133   : > { %2402 = vmatpush1.bf16.msra.mxu0 %v3647_v35  ;;  %2433 = vmatprep.mubr.bf16.mxu0 %v687_v36  ;;  %v3719_v35 = vld [vmem:[%s4041_s10 + $0x6c0] ss:$8 sps:$4 sm:$0xff]   ;;  %v3727_v36 = vld [vmem:[%s4041_s10 + $0x6d4] ss:$8 sps:$4 sm:$0xff]  }
 0x134   : > { %2222 = vmatmul.mubr.bf16.vlgmr.msra.gmra.mrb[8].mxu1 %v684_v37  ;;  %2403 = vmatprep.subr.bf16.mxu0 %v3655_v6  ;;  %v3722_v37 = vld [vmem:[%s4041_s10 + $0x7c0] ss:$8 sps:$4 sm:$0xff]   ;;  %v3730_v6 = vld [vmem:[%s4041_s10 + $0x7d4] ss:$8 sps:$4 sm:$0xff]  }
 0x135   : > { %2614 = vmatpush1.bf16.msra.mxu1 %v3650_v38  ;;  %2645 = vmatprep.mubr.bf16.mxu1 %v689_v39  ;;  %v3725_v38 = vld [vmem:[%s4041_s10 + $0x6d0] ss:$8 sps:$4 sm:$0xff]   ;;  %v3733_v39 = vld [vmem:[%s4041_s10 + $0x6e4] ss:$8 sps:$4 sm:$0xff]  }
 0x136   : > { %2615 = vmatprep.subr.bf16.mxu1 %v3658_v0  ;;  %v3728_v0 = vld [vmem:[%s4041_s10 + $0x7d0] ss:$8 sps:$4 sm:$0xff]  }
 0x137   : > { %2404 = vmatpush1.bf16.msra.mxu0 %v3653_v40  ;;  %v3736_v40 = vld [vmem:[%s4041_s10 + $0x7e4] ss:$8 sps:$4 sm:$0xff]  }
 0x138   : > { %2405 = vmatprep.subr.bf16.mxu0 %v3661_v2  ;;  %v3731_v2 = vld [vmem:[%s4041_s10 + $0x6e0] ss:$8 sps:$4 sm:$0xff]  }
 0x139   : > { %2616 = vmatpush1.bf16.msra.mxu1 %v3656_v29  ;;  %v3739_v29 = vld [vmem:[%s4041_s10 + $0x6f4] ss:$8 sps:$4 sm:$0xff]  }
 0x13a   : > { %2617 = vmatprep.subr.bf16.mxu1 %v3664_v41  ;;  %v3734_v41 = vld [vmem:[%s4041_s10 + $0x7e0] ss:$8 sps:$4 sm:$0xff]  }
 0x13b   : > { %2406 = vmatpush1.bf16.msra.mxu0 %v3659_v42  ;;  %v3742_v42 = vld [vmem:[%s4041_s10 + $0x7f4] ss:$8 sps:$4 sm:$0xff]  }
 0x13c   : > { %2407 = vmatprep.subr.bf16.mxu0 %v3667_v45  ;;  %v3737_v45 = vld [vmem:[%s4041_s10 + $0x6f0] ss:$8 sps:$4 sm:$0xff]  }
 0x13d   : > { %2618 = vmatpush1.bf16.msra.mxu1 %v3662_v46  ;;  %v3740_v46 = vld [vmem:[%s4041_s10 + $0x7f0] ss:$8 sps:$4 sm:$0xff]  }
 0x13e   : > { %2619 = vmatprep.subr.bf16.mxu1 %v3670_v47  ;;  %v686_v47 = vpack.c.bf16 %v4677_v19, %v4677_v19 }
 0x13f   : > { %2408 = vmatpush1.bf16.msra.mxu0 %v3665_v43  ;;  %v688_v43 = vpack.c.bf16 %v4682_v22, %v4682_v22 }
 0x140   : > { %2409 = vmatprep.subr.bf16.mxu0 %v3673_v48  ;;  %v4764_v48 = vstv %s948_s16 }
 0x141   : > { %2620 = vmatpush1.bf16.msra.mxu1 %v3668_v49  ;;  %v950_v49 = vmul.f32 %v4577_v50, %v4764_v48 }
 0x142   : > { %2621 = vmatprep.subr.bf16.mxu1 %v3676_v24  ;;  %v951_v24 = vmul.f32 %v4580_v53, %v4764_v48 }
 0x143   : > { %2410 = vmatpush1.bf16.msra.mxu0 %v3671_v52  ;;  %v1125_v52 = vrot.slane %v950_v49, %v4221_v10 }
 0x144   : > { %2411 = vmatprep.subr.bf16.mxu0 %v3679_v54  ;;  %v1337_v19 = vrot.slane %v951_v24, %v4221_v10 }
 0x145   : > { %2622 = vmatpush1.bf16.msra.mxu1 %v3674_v44  ;;  %v1126_v54 = vcombine.high %v1125_v52, %v1125_v52 }
 0x146   : > { %2623 = vmatprep.subr.bf16.mxu1 %v3682_v55  ;;  %v1338_v22 = vcombine.high %v1337_v19, %v1337_v19 }
 0x147   : > { %2412 = vmatpush1.bf16.msra.mxu0 %v3677_v56 }
 0x148   : > { %2413 = vmatprep.subr.bf16.mxu0 %v3685_v57 }
 0x149   : > { %2624 = vmatpush1.bf16.msra.mxu1 %v3680_v25 }
 0x14a   : > { %2625 = vmatprep.subr.bf16.mxu1 %v3688_v58 }
 0x14b   : > { %2414 = vmatpush1.bf16.msra.mxu0 %v3683_v59 }
 0x14c   : > { %2415 = vmatprep.subr.bf16.mxu0 %v3691_v62 }
 0x14d   : > { %2626 = vmatpush1.bf16.msra.mxu1 %v3686_v63 }
 0x14e   : > { %2627 = vmatprep.subr.bf16.mxu1 %v3694_v16 }
 0x14f   : > { %2416 = vmatpush1.bf16.msra.mxu0 %v3689_v30 }
 0x150   : > { %2417 = vmatprep.subr.bf16.mxu0 %v3697_v1 }
 0x151   : > { %2628 = vmatpush1.bf16.msra.mxu1 %v3692_v3  ;;  %v952_v3 = vmul.f32 %v4597_v9, %v4764_v48 }
 0x152   : > { %2629 = vmatprep.subr.bf16.mxu1 %v3700_v4  ;;  %v953_v4 = vmul.f32 %v4613_v17, %v4764_v48 }
 0x153   : > { %2418 = vmatpush1.bf16.msra.mxu0 %v3695_v7  ;;  %v1549_v7 = vrot.slane %v952_v3, %v4221_v10 }
 0x154   : > { %2419 = vmatprep.subr.bf16.mxu0 %v3703_v8  ;;  %v1761_v8 = vrot.slane %v953_v4, %v4221_v10 }
 0x155   : > { %2630 = vmatpush1.bf16.msra.mxu1 %v3698_v11  ;;  %v1550_v11 = vcombine.high %v1549_v7, %v1549_v7 }
 0x156   : > { %2631 = vmatprep.subr.bf16.mxu1 %v3706_v12 }
 0x157   : > { %2420 = vmatpush1.bf16.msra.mxu0 %v3701_v13  ;;  %v1762_v13 = vcombine.high %v1761_v8, %v1761_v8 }
 0x158   : > { %2421 = vmatprep.subr.bf16.mxu0 %v3709_v15 }
 0x159   : > { %2632 = vmatpush1.bf16.msra.mxu1 %v3704_v20 }
 0x15a   : > { %2633 = vmatprep.subr.bf16.mxu1 %v3712_v21 }
 0x15b   : > { %2422 = vmatpush1.bf16.msra.mxu0 %v3707_v26 }
 0x15c   : > { %2423 = vmatprep.subr.bf16.mxu0 %v3715_v27 }
 0x15d   : > { %2634 = vmatpush1.bf16.msra.mxu1 %v3710_v5 }
 0x15e   : > { %2635 = vmatprep.subr.bf16.mxu1 %v3718_v28 }
 0x15f   : > { %2424 = vmatpush1.bf16.msra.mxu0 %v3713_v18 }
 0x160   : > { %2425 = vmatprep.subr.bf16.mxu0 %v3721_v31 }
 0x161   : > { %2636 = vmatpush1.bf16.msra.mxu1 %v3716_v34 }
 0x162   : > { %2637 = vmatprep.subr.bf16.mxu1 %v3724_v33 }
 0x163   : > { %2426 = vmatpush1.bf16.msra.mxu0 %v3719_v35  ;;  %v954_v35 = vmul.f32 %v4629_v14, %v4764_v48 }
 0x164   : > { %2427 = vmatprep.subr.bf16.mxu0 %v3727_v36  ;;  %v955_v36 = vmul.f32 %v4644_v23, %v4764_v48 }
 0x165   : > { %2638 = vmatpush1.bf16.msra.mxu1 %v3722_v37  ;;  %v1973_v37 = vrot.slane %v954_v35, %v4221_v10 }
 0x166   : > { %2639 = vmatprep.subr.bf16.mxu1 %v3730_v6  ;;  %v2185_v6 = vrot.slane %v955_v36, %v4221_v10 }
 0x167   : > { %2428 = vmatpush1.bf16.msra.mxu0 %v3725_v38  ;;  %v1974_v38 = vcombine.high %v1973_v37, %v1973_v37 }
 0x168   : > { %2429 = vmatprep.subr.bf16.mxu0 %v3733_v39 }
 0x169   : > { %2640 = vmatpush1.bf16.msra.mxu1 %v3728_v0  ;;  %v2186_v0 = vcombine.high %v2185_v6, %v2185_v6 }
 0x16a   : > { %2641 = vmatprep.subr.bf16.mxu1 %v3736_v40 }
 0x16b   : > { %2430 = vmatpush1.bf16.msra.mxu0 %v3731_v2 }
 0x16c   : > { %2431 = vmatprep.subr.bf16.mxu0 %v3739_v29 }
 0x16d   : > { %2642 = vmatpush1.bf16.msra.mxu1 %v3734_v41 }
 0x16e   : > { %2643 = vmatprep.subr.bf16.mxu1 %v3742_v42 }
 0x16f   : > { %2432 = vmatpush1.bf16.msra.mxu0 %v3737_v45 }
 0x171   : > { %2644 = vmatpush1.bf16.msra.mxu1 %v3740_v46 }
 0x172   : > { %2434 = vmatmul.mubr.bf16.vlgmr.msra.gmra.mrb[12].mxu0 %v686_v47 }
 0x174   : > { %2646 = vmatmul.mubr.bf16.vlgmr.msra.gmra.mrb[12].mxu1 %v688_v43 }
 0x185   : > { %v1163_v44 = vpop.f32.mrb[0].mxu0 }
 0x186   : > { %v4772_v55 = vadd.f32 %v1163_v44, %v1125_v52  ;;  %v1165_v56 = vpop.f32.mrb[1].mxu0  ;;  %v1375_v57 = vpop.f32.mrb[0].mxu1  ;;  %v956_v52 = vmul.f32 %v4654_v32, %v4764_v48 }
 0x187   : > { %v4774_v25 = vadd.f32 %v1165_v56, %v1126_v54  ;;  %v1167_v58 = vpop.f32.mrb[2].mxu0  ;;  %v4776_v59 = vadd.f32 %v1375_v57, %v1337_v19  ;;  %v1377_v50 = vpop.f32.mrb[1].mxu1  ;;  %v957_v19 = vmul.f32 %v4664_v61, %v4764_v48 }
 0x188   : > { %v1168_v62 = vpop.f32.mrb[3].mxu0  ;;  %v4782_v63 = vadd.f32 %v1377_v50, %v1338_v22  ;;  %v1379_v16 = vpop.f32.mrb[2].mxu1  ;;  %v2397_v54 = vrot.slane %v956_v52, %v4221_v10 }
 0x189   : > { %v4780_v53 = vcombine.low %v4772_v55, %v4774_v25  ;;  %v1380_v30 = vpop.f32.mrb[3].mxu1  ;;  %v2609_v44 = vrot.slane %v957_v19, %v4221_v10  ;;  %v2763_v10 = vsel (!%p3282_p7), %vm2762_vm0, %v4772_v55, 0.0  ;;  %v2764_v48 = vsel (!%p3282_p7), %vm2762_vm0, %v4774_v25, 0.0 }
 0x18a   : > { %v4787_v1 = vcombine.low %v4776_v59, %v4782_v63  ;;  %v2398_v22 = vcombine.high %v2397_v54, %v2397_v54 }
 0x18b   : > { %3274 = vst.sshfl [vmem:[#allocation2] sm:$0x33 pattern:$0x76325410] %v4780_v53  ;;  %v2610_v57 = vcombine.high %v2609_v44, %v2609_v44 }
 0x18c   : > { %3275 = vst.sshfl [vmem:[#allocation2 + $0x4] sm:$0x33 pattern:$0x76325410] %v4787_v1 }
 0x18d   : > { %3283 = vst.sshfl [vmem:[%s4936_s23] sm:$0x33 pattern:$0x76325410] (!%p3282_p7), %v4780_v53 }
 0x18e   : > { %3284 = vst.sshfl [vmem:[%s4936_s23 + $0x4] sm:$0x33 pattern:$0x76325410] (!%p3282_p7), %v4787_v1 }
 0x1c5   : > { %v1587_v12 = vpop.f32.mrb[4].mxu0 }
 0x1c6   : > { %v4796_v15 = vadd.f32 %v1587_v12, %v1549_v7  ;;  %v1589_v20 = vpop.f32.mrb[5].mxu0 }
 0x1c7   : > { %v1799_v21 = vpop.f32.mrb[4].mxu1  ;;  %v4798_v26 = vadd.f32 %v1589_v20, %v1550_v11  ;;  %v1591_v27 = vpop.f32.mrb[6].mxu0 }
 0x1c8   : > { %v4800_v5 = vadd.f32 %v1799_v21, %v1761_v8  ;;  %v1801_v9 = vpop.f32.mrb[5].mxu1  ;;  %v1592_v28 = vpop.f32.mrb[7].mxu0  ;;  %v2773_v53 = vsel (!%p3282_p7), %vm2762_vm0, %v4796_v15, 0.0  ;;  %v2768_v21 = vsel (!%p3282_p7), %vm2762_vm0, %v4776_v59, 0.0  ;;  %v2769_v27 = vsel (!%p3282_p7), %vm2762_vm0, %v4782_v63, 0.0 }
 0x1c9   : > { %v2686_v17 = vcombine.low %v4796_v15, %v4798_v26  ;;  %v4804_v18 = vadd.f32 %v1801_v9, %v1762_v13  ;;  %v1803_v31 = vpop.f32.mrb[6].mxu1  ;;  %v2774_v1 = vsel (!%p3282_p7), %vm2762_vm0, %v4798_v26, 0.0  ;;  %v2765_v13 = vadd.f32 (!%p3282_p7), %v2764_v48, %v2763_v10 }
 0x1ca   : > { %v1804_v34 = vpop.f32.mrb[7].mxu1  ;;  %v2775_v20 = vadd.f32 (!%p3282_p7), %v2774_v1, %v2773_v53  ;;  %v2778_v55 = vsel (!%p3282_p7), %vm2762_vm0, %v4800_v5, 0.0  ;;  %v2770_v15 = vadd.f32 (!%p3282_p7), %v2769_v27, %v2768_v21 }
 0x1cb   : > { %3276 = vst.sshfl [vmem:[#allocation2 + $0x8] sm:$0x33 pattern:$0x76325410] %v2686_v17  ;;  %v2694_v33 = vcombine.low %v4800_v5, %v4804_v18  ;;  %v2779_v25 = vsel (!%p3282_p7), %vm2762_vm0, %v4804_v18, 0.0  ;;  %2766 = vadd.xlane.f32.xlu0 (!%p3282_p7), %v2765_v13 }
 0x1cc   : > { %3285 = vst.sshfl [vmem:[%s4936_s23 + $0x8] sm:$0x33 pattern:$0x76325410] (!%p3282_p7), %v2686_v17  ;;  %2776 = vadd.xlane.f32.xlu1 (!%p3282_p7), %v2775_v20  ;;  %v2780_v9 = vadd.f32 (!%p3282_p7), %v2779_v25, %v2778_v55 }
 0x1cd   : > { %3277 = vst.sshfl [vmem:[#allocation2 + $0xc] sm:$0x33 pattern:$0x76325410] %v2694_v33 }
 0x1ce   : > { %3286 = vst.sshfl [vmem:[%s4936_s23 + $0xc] sm:$0x33 pattern:$0x76325410] (!%p3282_p7), %v2694_v33 }
 0x1cf   : > { %2771 = vadd.xlane.f32.xlu0 (!%p3282_p7), %v2770_v15 }
 0x1d0   : > { %2781 = vadd.xlane.f32.xlu1 (!%p3282_p7), %v2780_v9 }
 0x205   : > { %v2011_v39 = vpop.f32.mrb[8].mxu0 }
 0x206   : > { %v2012_v40 = vadd.f32 %v2011_v39, %v1973_v37  ;;  %v2013_v2 = vpop.f32.mrb[9].mxu0  ;;  %v3868_v37 = vmov (!%p3282_p7), 0.0   ;;  %v2827_v39 = vand.u32 (!%p3282_p7), 127, %v597_v51 }
 0x207   : > { %v2223_v29 = vpop.f32.mrb[8].mxu1  ;;  %v2014_v41 = vadd.f32 %v2013_v2, %v1974_v38  ;;  %v2015_v42 = vpop.f32.mrb[10].mxu0  ;;  %3297 = vmatprep.subr.mxu0 (!%p3282_p7), %v3868_v37  ;;  %3299 = vmatprep.mubr.msk.f32.mxu0 (!%p3282_p7), %vm3869_vm1, %v3868_v37  ;;  %v3870_v38 = vmov (!%p3282_p7), 0  }
 0x208   : > { %v2224_v45 = vadd.f32 %v2223_v29, %v2185_v6  ;;  %v2225_v46 = vpop.f32.mrb[9].mxu1  ;;  %v2016_v47 = vpop.f32.mrb[11].mxu0  ;;  %v2783_v26 = vsel (!%p3282_p7), %vm2762_vm0, %v2012_v40, 0.0  ;;  %v2812_v6 = vld [vmem:[%s4937_s12] sm:$0x7] (!%p3282_p7)  ;;  %3751 = vset.pattern.permute.xlu0 (!%p3282_p7), %v3870_v38  ;;  %v2830_v2 = vsub.s32 (!%p3282_p7), %v2827_v39, %v4197_v60 }
 0x209   : > { %v2702_v43 = vcombine.low %v2012_v40, %v2014_v41  ;;  %v2226_v14 = vadd.f32 %v2225_v46, %v2186_v0  ;;  %v2227_v49 = vpop.f32.mrb[10].mxu1  ;;  %v2784_v28 = vsel (!%p3282_p7), %vm2762_vm0, %v2014_v41, 0.0 }
 0x20a   : > { %v2228_v24 = vpop.f32.mrb[11].mxu1  ;;  %v2788_v17 = vsel (!%p3282_p7), %vm2762_vm0, %v2224_v45, 0.0  ;;  %v2785_v63 = vadd.f32 (!%p3282_p7), %v2784_v28, %v2783_v26 }
 0x20b   : > { %3278 = vst.sshfl [vmem:[#allocation2 + $0x10] sm:$0x33 pattern:$0x76325410] %v2702_v43  ;;  %v2710_v23 = vcombine.low %v2224_v45, %v2226_v14  ;;  %v2789_v59 = vsel (!%p3282_p7), %vm2762_vm0, %v2226_v14, 0.0 }
 0x20c   : > { %3287 = vst.sshfl [vmem:[%s4936_s23 + $0x10] sm:$0x33 pattern:$0x76325410] (!%p3282_p7), %v2702_v43  ;;  %v2790_v31 = vadd.f32 (!%p3282_p7), %v2789_v59, %v2788_v17  ;;  %2786 = vadd.xlane.f32.xlu0 (!%p3282_p7), %v2785_v63 }
 0x20d   : > { %3279 = vst.sshfl [vmem:[#allocation2 + $0x14] sm:$0x33 pattern:$0x76325410] %v2710_v23 }
 0x20e   : > { %3288 = vst.sshfl [vmem:[%s4936_s23 + $0x14] sm:$0x33 pattern:$0x76325410] (!%p3282_p7), %v2710_v23  ;;  %2791 = vadd.xlane.f32.xlu1 (!%p3282_p7), %v2790_v31 }
 0x245   : > { %v2435_v56 = vpop.f32.mrb[12].mxu0 }
 0x246   : > { %v2436_v58 = vadd.f32 %v2435_v56, %v2397_v54  ;;  %v2437_v50 = vpop.f32.mrb[13].mxu0 }
 0x247   : > { %v2647_v62 = vpop.f32.mrb[12].mxu1  ;;  %v2438_v16 = vadd.f32 %v2437_v50, %v2398_v22  ;;  %v2439_v30 = vpop.f32.mrb[14].mxu0  ;;  %2753 = sbr.rel (%p3282_p7) target bundleno = 953 (0x3b9), region = 52 }
 0x248   : > { %v2648_v3 = vadd.f32 %v2647_v62, %v2609_v44  ;;  %v2649_v4 = vpop.f32.mrb[13].mxu1  ;;  %v2440_v7 = vpop.f32.mrb[15].mxu0  ;;  %v2793_v5 = vsel (!%p3282_p7), %vm2762_vm0, %v2436_v58, 0.0 }
 0x249   : > { %v2718_v8 = vcombine.low %v2436_v58, %v2438_v16  ;;  %v2650_v32 = vadd.f32 %v2649_v4, %v2610_v57  ;;  %v2651_v11 = vpop.f32.mrb[14].mxu1  ;;  %v2794_v18 = vsel (!%p3282_p7), %vm2762_vm0, %v2438_v16, 0.0 }
 0x24a   : > { %v2652_v12 = vpop.f32.mrb[15].mxu1  ;;  %v2798_v34 = vsel (!%p3282_p7), %vm2762_vm0, %v2648_v3, 0.0  ;;  %v2795_v35 = vadd.f32 (!%p3282_p7), %v2794_v18, %v2793_v5 }
 0x24b   : > { %3280 = vst.sshfl [vmem:[#allocation2 + $0x18] sm:$0x33 pattern:$0x76325410] %v2718_v8  ;;  %v2726_v61 = vcombine.low %v2648_v3, %v2650_v32  ;;  %v2799_v33 = vsel (!%p3282_p7), %vm2762_vm0, %v2650_v32, 0.0 }
 0x24c   : > { %3289 = vst.sshfl [vmem:[%s4936_s23 + $0x18] sm:$0x33 pattern:$0x76325410] (!%p3282_p7), %v2718_v8  ;;  %v2800_v36 = vadd.f32 (!%p3282_p7), %v2799_v33, %v2798_v34  ;;  %2796 = vadd.xlane.f32.xlu0 (!%p3282_p7), %v2795_v35  ;;  %v2811_v8 = vld [vmem:[#allocation7] sm:$0x7] (!%p3282_p7) }
 0x24d   : > { %3281 = vst.sshfl [vmem:[#allocation2 + $0x1c] sm:$0x33 pattern:$0x76325410] %v2726_v61 }
 0x24e   : > { %3290 = vst.sshfl [vmem:[%s4936_s23 + $0x1c] sm:$0x33 pattern:$0x76325410] %v2726_v61  ;;  %2801 = vadd.xlane.f32.xlu1 %v2800_v36 }
 0x258   : > { %v2767_v0 = vpop.xlane.xlu0 %2766 }
 0x259   : > { %v2777_v40 = vpop.xlane.xlu1 %2776  ;;  %v2803_v29 = vmul.f32 0.00390625, %v2767_v0 }
 0x25a   : > { %v2805_v41 = vmul.f32 0.00390625, %v2777_v40 }
 0x25b   : > { %v2831_v43 = vrot.slane %v2803_v29, %v2830_v2 }
 0x25c   : > { %v2772_v42 = vpop.xlane.xlu0 %2771  ;;  %v2839_v24 = vrot.slane %v2805_v41, %v2830_v2 }
 0x25d   : > { %v2782_v45 = vpop.xlane.xlu1 %2781  ;;  %v2804_v46 = vmul.f32 0.00390625, %v2772_v42 }
 0x25e   : > { %v2806_v47 = vmul.f32 0.00390625, %v2782_v45 }
 0x25f   : > { %v2835_v14 = vrot.slane %v2804_v46, %v2830_v2 }
 0x260   : > { %v2843_v49 = vrot.slane %v2806_v47, %v2830_v2 }
 0x261   : > { %v2861_v51 = vsel %vm2860_vm2, %v2835_v14, %v2831_v43 }
 0x262   : > { %2815 = vperm.xlu0 %3751, %v2812_v6   ;;  %v2863_v44 = vsel %vm2862_vm3, %v2839_v24, %v2861_v51 }
 0x263   : > { %v2865_v60 = vsel %vm2864_vm4, %v2843_v49, %v2863_v44 }
 0x299   : > { %v2787_v23 = vpop.xlane.xlu0 %2786 }
 0x29a   : > { %v2807_v19 = vmul.f32 0.00390625, %v2787_v23 }
 0x29b   : > { %v2792_v52 = vpop.xlane.xlu1 %2791 }
 0x29c   : > { %v2808_v54 = vmul.f32 0.00390625, %v2792_v52  ;;  %v2847_v22 = vrot.slane %v2807_v19, %v2830_v2 }
 0x29e   : > { %v2851_v56 = vrot.slane %v2808_v54, %v2830_v2  ;;  %v2867_v50 = vsel %vm2866_vm5, %v2847_v22, %v2865_v60 }
 0x2a0   : > { %v2869_v4 = vsel %vm2868_vm6, %v2851_v56, %v2867_v50 }
 0x2d9   : > { %v2797_v57 = vpop.xlane.xlu0 %2796 }
 0x2da   : > { %v2809_v62 = vmul.f32 0.00390625, %v2797_v57 }
 0x2db   : > { %v2802_v58 = vpop.xlane.xlu1 %2801 }
 0x2dc   : > { %v2810_v16 = vmul.f32 0.00390625, %v2802_v58  ;;  %v2855_v30 = vrot.slane %v2809_v62, %v2830_v2 }
 0x2de   : > { %v2859_v3 = vrot.slane %v2810_v16, %v2830_v2  ;;  %v2871_v7 = vsel %vm2870_vm7, %v2855_v30, %v2869_v4 }
 0x2e0   : > { %v2873_v32 = vsel %vm2872_vm8, %v2859_v3, %v2871_v7 }
 0x2e1   : > { %3298 = vmatpush3.msra.mxu0 %v2873_v32  ;;  %v2816_v11 = vpop.permute.xlu0 %2815 }
 0x2e2   : > { %3300 = vmatmul.mubr.msk.f32.vlgmr.msra.gmra.mrb[0].mxu0 %vm2875_vm9, %v2811_v8 }
 0x3b5   : > { %v2945_v12 = vpop.f32.mrb[0].mxu0 }
 0x3b6   : > { %v2946_v61 = vadd.f32 %v2945_v12, %v2816_v11  ;;  %v3301_v10 = vpop.f32.mrb[1].mxu0 }
 0x3b8   : > { %2950 = vst.msk [vmem:[%s4938_s1] sm:$0x7] %vm2949_vm10, %v2946_v61 }
 0x3b9 PF: > { %s4939_s10 = sld [smem:[#allocation15_spill]]  ;;  %s4940_s7 = sld [smem:[#allocation12_spill]] }
 0x3ba   : > { %s4941_s8 = sld [smem:[#allocation13_spill]]  ;;  %s4942_s9 = sld [smem:[#allocation16_spill]] }
 0x3bf   : > { %p22_p10 = scmp.ge.s32.totalorder %s4939_s10, 5  }
 0x3c1   :  { %24 = sbr.rel (!%p22_p10) target bundleno = 17 (0x11), region = 92 }
 0x3c8   :  { %2968 = vsyncpa [#allocation6], 1 }
 0x3c9   :  { %2970 = vsyncpa [#allocation6 + $0x1], 1 }
 0x3ca   :  { %2971 = vsyncpa [#allocation8], 1 }

</bundles_post_ra>
